<compile_context>
chip_gen: v7x
topology: tpu7x:2x2x1
jax: 0.10.0
libtpu: 0.0.40
codegen_flags: <defaults>
</compile_context>

<pallas_src>
import functools
import math

import jax
import jax.numpy as jnp
from jax.experimental import pallas as pl
from jax.experimental.pallas import tpu as pltpu

NEG_SLOPE = 0.01                      # PyTorch nn.LeakyReLU default negative_slope
HIDDEN_DIMS = (500, 400, 300, 200, 100)
LANE = 128
SUBLANE = 8


def _round_up(x, m):
    return ((x + m - 1) // m) * m


def fc_classifier_kernel(
    x_ref,
    w1_ref, b1_ref,
    w2_ref, b2_ref,
    w3_ref, b3_ref,
    w4_ref, b4_ref,
    w5_ref, b5_ref,
    w6_ref, b6_ref,
    o_ref,
    *,
    valid_out,
):
    """One batch tile: 5x (Linear + LeakyReLU) -> Linear -> masked LogSoftmax."""
    h = x_ref[...]                                   # bf16, streamed

    def block(h_bf16, w_ref, b_ref):
        # bf16 operands on the MXU, f32 accumulation; LeakyReLU in f32, store bf16.
        y = jnp.dot(h_bf16, w_ref[...],
                    preferred_element_type=jnp.float32) + b_ref[...]
        return jnp.where(y > 0, y, NEG_SLOPE * y).astype(jnp.bfloat16)

    h = block(h, w1_ref, b1_ref)   # in_p  -> 512
    h = block(h, w2_ref, b2_ref)   # 512   -> 512
    h = block(h, w3_ref, b3_ref)   # 512   -> 384
    h = block(h, w4_ref, b4_ref)   # 384   -> 256
    h = block(h, w5_ref, b5_ref)   # 256   -> 128

    # Final Linear (128 -> out_p), no activation; f32 accumulation.
    logits = jnp.dot(h, w6_ref[...],
                     preferred_element_type=jnp.float32) + b6_ref[...]

    # Padded logit lanes must not enter the softmax denominator.
    lane_ids = jax.lax.broadcasted_iota(jnp.int32, logits.shape, dimension=1)
    logits = jnp.where(lane_ids < valid_out, logits, jnp.float32(-1e30))

    # Numerically stable LogSoftmax(dim=-1).
    m = jnp.max(logits, axis=-1, keepdims=True)
    z = logits - m
    lse = jnp.log(jnp.sum(jnp.exp(z), axis=-1, keepdims=True))
    o_ref[...] = (z - lse).astype(o_ref.dtype)


def _choose_tile_b(B, tile_b_max):
    b_min = _round_up(max(B, 1), SUBLANE)
    tile_b = min(tile_b_max, b_min)
    # Split batches >= 256 rows into >= 2 grid steps so the "parallel" axis can
    # shard across both v7x TensorCores; round to a multiple of 128 (also keeps
    # the tile MXU-friendly on v5e).  No harm on single-TC v5e/v6e.
    if b_min >= 2 * LANE:
        half = _round_up((b_min + 1) // 2, LANE)
        tile_b = max((min(tile_b, half) // LANE) * LANE, LANE)
    return tile_b


def fc_classifier_forward(x, padded_params, out_dim, *, tile_b=1024,
                          vmem_limit_bytes=None):
    """x: (B, in_dim).  padded_params: list of (W (in_p, out_p) bf16, b (1, out_p) f32)."""
    B, in_dim = x.shape
    in_p = padded_params[0][0].shape[0]
    out_p = padded_params[-1][0].shape[1]

    # Stream x in bf16 (halves DMA bytes / VMEM footprint; numerically identical to
    # the reference, which casts to bf16 at the first dot anyway).
    x = x.astype(jnp.bfloat16)
    if in_p != in_dim:
        # Zero-pad features; the matching weight rows are zero so the result is unchanged.
        x = jnp.pad(x, ((0, 0), (0, in_p - in_dim)))

    # Batch tiling: one grid step per tile_b rows; weights stay resident across steps.
    tile_b = _choose_tile_b(B, tile_b)
    b_pad = _round_up(B, tile_b)
    if b_pad != B:
        x = jnp.pad(x, ((0, b_pad - B), (0, 0)))
    grid = (b_pad // tile_b,)

    flat_args = [x]
    in_specs = [pl.BlockSpec((tile_b, in_p), lambda i: (i, 0))]
    weight_bytes = 0
    for w, b in padded_params:
        flat_args += [w, b]
        in_specs += [
            pl.BlockSpec(w.shape, lambda i: (0, 0)),   # constant block -> VMEM-resident
            pl.BlockSpec(b.shape, lambda i: (0, 0)),
        ]
        weight_bytes += w.nbytes + b.nbytes

    # VMEM budget: the default pipeline double-buffers every input (even constant
    # index_map blocks) plus the streamed x/out tiles; add generous headroom for the
    # in-kernel activation temporaries.
    x_tile_bytes = tile_b * in_p * 2              # bf16
    out_tile_bytes = tile_b * out_p * 4           # f32
    max_width = max(w.shape[1] for w, _ in padded_params)
    act_bytes = tile_b * max_width * (4 + 2) * 2  # f32 + bf16 full-width temporaries, x2 margin
    vmem_need = 2 * weight_bytes + 2 * (x_tile_bytes + out_tile_bytes) + act_bytes
    assert vmem_need < (56 << 20), (
        "model too large for a fully VMEM-resident kernel on v7x (64 MiB); "
        "K-tile the first layer or shrink tile_b")
    if vmem_limit_bytes is None:
        vmem_limit_bytes = max(32 << 20,
                               min(_round_up(vmem_need, 1 << 20) + (8 << 20), 64 << 20))

    flops = 2 * b_pad * sum(w.shape[0] * w.shape[1] for w, _ in padded_params)
    bytes_accessed = x.nbytes + b_pad * out_p * 4 + weight_bytes
    cost = pl.CostEstimate(flops=flops, transcendentals=b_pad * out_p,
                           bytes_accessed=bytes_accessed)

    out = pl.pallas_call(
        functools.partial(fc_classifier_kernel, valid_out=out_dim),
        out_shape=jax.ShapeDtypeStruct((b_pad, out_p), jnp.float32),
        grid=grid,
        in_specs=in_specs,
        out_specs=pl.BlockSpec((tile_b, out_p), lambda i: (i, 0)),
        compiler_params=pltpu.CompilerParams(
            dimension_semantics=("parallel",),          # megacore sharding on v7x
            vmem_limit_bytes=vmem_limit_bytes),
        cost_estimate=cost,
    )(*flat_args)

    return out[:B, :out_dim]


def init_params(key, in_dim, out_dim):
    """PyTorch nn.Linear default init: W, b ~ U(-1/sqrt(fan_in), 1/sqrt(fan_in)), W is (out, in)."""
    dims = [in_dim] + list(HIDDEN_DIMS) + [out_dim]
    params = []
    for i in range(len(dims) - 1):
        fan_in, fan_out = dims[i], dims[i + 1]
        key, kw, kb = jax.random.split(key, 3)
        bound = 1.0 / math.sqrt(fan_in)
        w = jax.random.uniform(kw, (fan_out, fan_in), jnp.float32, -bound, bound)
        b = jax.random.uniform(kb, (fan_out,), jnp.float32, -bound, bound)
        params.append((w, b))
    return params


def prepare_params(raw_params):
    """Transpose to (in, out), zero-pad both dims to multiples of 128, cast W to bf16."""
    padded = []
    for w, b in raw_params:
        fan_out, fan_in = w.shape
        in_p = _round_up(fan_in, LANE)
        out_p = _round_up(fan_out, LANE)
        w_t = jnp.zeros((in_p, out_p), jnp.float32).at[:fan_in, :fan_out].set(w.T)
        b_p = jnp.zeros((1, out_p), jnp.float32).at[0, :fan_out].set(b)
        padded.append((w_t.astype(jnp.bfloat16), b_p))
    return padded


def reference_forward(x, padded_params, out_dim):
    """Pure-JAX reference using the same padded bf16 weights / f32 accumulation."""
    in_p = padded_params[0][0].shape[0]
    h = jnp.pad(x.astype(jnp.float32), ((0, 0), (0, in_p - x.shape[1])))
    n = len(padded_params)
    logits = None
    for i, (w, b) in enumerate(padded_params):
        y = jnp.dot(h.astype(jnp.bfloat16), w, preferred_element_type=jnp.float32) + b
        if i < n - 1:
            h = jnp.where(y > 0, y, NEG_SLOPE * y)
        else:
            logits = y[:, :out_dim]
    return jax.nn.log_softmax(logits, axis=-1)


if __name__ == "__main__":
    key = jax.random.PRNGKey(0)
    in_dim, out_dim = 64, 10

    kx, kp, kx2 = jax.random.split(key, 3)
    raw_params = init_params(kp, in_dim, out_dim)
    params = prepare_params(raw_params)

    # Small batch: single grid step.
    batch = 8
    x = jax.random.normal(kx, (batch, in_dim), jnp.float32)
    out = jax.block_until_ready(fc_classifier_forward(x, params, out_dim))
    ref = reference_forward(x, params, out_dim)
    assert out.shape == (batch, out_dim)
    assert jnp.allclose(out, ref, atol=2e-3, rtol=2e-3), "mismatch vs reference (batch=8)"

    # Moderately larger batch: exercises the >=2-step parallel grid and batch padding.
    batch2 = 300
    x2 = jax.random.normal(kx2, (batch2, in_dim), jnp.float32)
    out2 = jax.block_until_ready(fc_classifier_forward(x2, params, out_dim))
    ref2 = reference_forward(x2, params, out_dim)
    assert out2.shape == (batch2, out_dim)
    assert jnp.allclose(out2, ref2, atol=2e-3, rtol=2e-3), "mismatch vs reference (batch=300)"

    print("KERNEL_OK")
</pallas_src>

<mosaic_0001>
module attributes {stable_mosaic.version = 11 : i64} {
  func.func @fc_classifier_kernel(%arg0: i32, %arg1: memref<8x128xbf16, #tpu.memory_space<vmem>>, %arg2: memref<128x512xbf16, #tpu.memory_space<vmem>>, %arg3: memref<1x512xf32, #tpu.memory_space<vmem>>, %arg4: memref<512x512xbf16, #tpu.memory_space<vmem>>, %arg5: memref<1x512xf32, #tpu.memory_space<vmem>>, %arg6: memref<512x384xbf16, #tpu.memory_space<vmem>>, %arg7: memref<1x384xf32, #tpu.memory_space<vmem>>, %arg8: memref<384x256xbf16, #tpu.memory_space<vmem>>, %arg9: memref<1x256xf32, #tpu.memory_space<vmem>>, %arg10: memref<256x128xbf16, #tpu.memory_space<vmem>>, %arg11: memref<1x128xf32, #tpu.memory_space<vmem>>, %arg12: memref<128x128xbf16, #tpu.memory_space<vmem>>, %arg13: memref<1x128xf32, #tpu.memory_space<vmem>>, %arg14: memref<8x128xf32, #tpu.memory_space<vmem>>) attributes {dimension_semantics = [#tpu.dimension_semantics<parallel>], iteration_bounds = array<i64: 1>, scalar_prefetch = 0 : i64, scratch_operands = 0 : i64, tpu.core_type = #tpu.core_type<tc>, window_params = [{transform_indices = @transform_0, window_bounds = array<i64: 8, 128>}, {pipeline_mode = #tpu.pipeline_mode<synchronous>, transform_indices = @transform_1, window_bounds = array<i64: 128, 512>}, {pipeline_mode = #tpu.pipeline_mode<synchronous>, transform_indices = @transform_2, window_bounds = array<i64: 1, 512>}, {pipeline_mode = #tpu.pipeline_mode<synchronous>, transform_indices = @transform_3, window_bounds = array<i64: 512, 512>}, {pipeline_mode = #tpu.pipeline_mode<synchronous>, transform_indices = @transform_4, window_bounds = array<i64: 1, 512>}, {pipeline_mode = #tpu.pipeline_mode<synchronous>, transform_indices = @transform_5, window_bounds = array<i64: 512, 384>}, {pipeline_mode = #tpu.pipeline_mode<synchronous>, transform_indices = @transform_6, window_bounds = array<i64: 1, 384>}, {pipeline_mode = #tpu.pipeline_mode<synchronous>, transform_indices = @transform_7, window_bounds = array<i64: 384, 256>}, {pipeline_mode = #tpu.pipeline_mode<synchronous>, transform_indices = @transform_8, window_bounds = array<i64: 1, 256>}, {pipeline_mode = #tpu.pipeline_mode<synchronous>, transform_indices = @transform_9, window_bounds = array<i64: 256, 128>}, {pipeline_mode = #tpu.pipeline_mode<synchronous>, transform_indices = @transform_10, window_bounds = array<i64: 1, 128>}, {pipeline_mode = #tpu.pipeline_mode<synchronous>, transform_indices = @transform_11, window_bounds = array<i64: 128, 128>}, {pipeline_mode = #tpu.pipeline_mode<synchronous>, transform_indices = @transform_12, window_bounds = array<i64: 1, 128>}, {transform_indices = @transform_13, window_bounds = array<i64: 8, 128>}]} {
    %c0 = arith.constant 0 : index
    %c0_0 = arith.constant 0 : index
    %0 = vector.load %arg1[%c0, %c0_0] : memref<8x128xbf16, #tpu.memory_space<vmem>>, vector<8x128xbf16>
    %c0_1 = arith.constant 0 : index
    %c0_2 = arith.constant 0 : index
    %1 = vector.load %arg2[%c0_1, %c0_2] : memref<128x512xbf16, #tpu.memory_space<vmem>>, vector<128x512xbf16>
    %cst = arith.constant dense<0.000000e+00> : vector<8x512xf32>
    %2 = tpu.matmul %0, %1, %cst {dimension_numbers = #tpu.dot_dimension_numbers<[1], [0], [0], [1], [0, 0, 1, 1], [], []>} : vector<8x128xbf16>, vector<128x512xbf16>, vector<8x512xf32> -> vector<8x512xf32>
    %c0_3 = arith.constant 0 : index
    %c0_4 = arith.constant 0 : index
    %3 = vector.load %arg3[%c0_3, %c0_4] : memref<1x512xf32, #tpu.memory_space<vmem>>, vector<1x512xf32>
    %4 = vector.broadcast %3 : vector<1x512xf32> to vector<8x512xf32>
    %5 = arith.addf %2, %4 : vector<8x512xf32>
    %cst_5 = arith.constant 0.000000e+00 : f32
    %6 = vector.broadcast %cst_5 : f32 to vector<8x512xf32>
    %7 = arith.cmpf ogt, %5, %6 : vector<8x512xf32>
    %cst_6 = arith.constant 0.00999999977 : f32
    %8 = vector.broadcast %cst_6 : f32 to vector<8x512xf32>
    %9 = arith.mulf %8, %5 : vector<8x512xf32>
    %10 = arith.select %7, %5, %9 : vector<8x512xi1>, vector<8x512xf32>
    %11 = arith.truncf %10 : vector<8x512xf32> to vector<8x512xbf16>
    %c0_7 = arith.constant 0 : index
    %c0_8 = arith.constant 0 : index
    %12 = vector.load %arg4[%c0_7, %c0_8] : memref<512x512xbf16, #tpu.memory_space<vmem>>, vector<512x512xbf16>
    %cst_9 = arith.constant dense<0.000000e+00> : vector<8x512xf32>
    %13 = tpu.matmul %11, %12, %cst_9 {dimension_numbers = #tpu.dot_dimension_numbers<[1], [0], [0], [1], [0, 0, 1, 1], [], []>} : vector<8x512xbf16>, vector<512x512xbf16>, vector<8x512xf32> -> vector<8x512xf32>
    %c0_10 = arith.constant 0 : index
    %c0_11 = arith.constant 0 : index
    %14 = vector.load %arg5[%c0_10, %c0_11] : memref<1x512xf32, #tpu.memory_space<vmem>>, vector<1x512xf32>
    %15 = vector.broadcast %14 : vector<1x512xf32> to vector<8x512xf32>
    %16 = arith.addf %13, %15 : vector<8x512xf32>
    %cst_12 = arith.constant 0.000000e+00 : f32
    %17 = vector.broadcast %cst_12 : f32 to vector<8x512xf32>
    %18 = arith.cmpf ogt, %16, %17 : vector<8x512xf32>
    %cst_13 = arith.constant 0.00999999977 : f32
    %19 = vector.broadcast %cst_13 : f32 to vector<8x512xf32>
    %20 = arith.mulf %19, %16 : vector<8x512xf32>
    %21 = arith.select %18, %16, %20 : vector<8x512xi1>, vector<8x512xf32>
    %22 = arith.truncf %21 : vector<8x512xf32> to vector<8x512xbf16>
    %c0_14 = arith.constant 0 : index
    %c0_15 = arith.constant 0 : index
    %23 = vector.load %arg6[%c0_14, %c0_15] : memref<512x384xbf16, #tpu.memory_space<vmem>>, vector<512x384xbf16>
    %cst_16 = arith.constant dense<0.000000e+00> : vector<8x384xf32>
    %24 = tpu.matmul %22, %23, %cst_16 {dimension_numbers = #tpu.dot_dimension_numbers<[1], [0], [0], [1], [0, 0, 1, 1], [], []>} : vector<8x512xbf16>, vector<512x384xbf16>, vector<8x384xf32> -> vector<8x384xf32>
    %c0_17 = arith.constant 0 : index
    %c0_18 = arith.constant 0 : index
    %25 = vector.load %arg7[%c0_17, %c0_18] : memref<1x384xf32, #tpu.memory_space<vmem>>, vector<1x384xf32>
    %26 = vector.broadcast %25 : vector<1x384xf32> to vector<8x384xf32>
    %27 = arith.addf %24, %26 : vector<8x384xf32>
    %cst_19 = arith.constant 0.000000e+00 : f32
    %28 = vector.broadcast %cst_19 : f32 to vector<8x384xf32>
    %29 = arith.cmpf ogt, %27, %28 : vector<8x384xf32>
    %cst_20 = arith.constant 0.00999999977 : f32
    %30 = vector.broadcast %cst_20 : f32 to vector<8x384xf32>
    %31 = arith.mulf %30, %27 : vector<8x384xf32>
    %32 = arith.select %29, %27, %31 : vector<8x384xi1>, vector<8x384xf32>
    %33 = arith.truncf %32 : vector<8x384xf32> to vector<8x384xbf16>
    %c0_21 = arith.constant 0 : index
    %c0_22 = arith.constant 0 : index
    %34 = vector.load %arg8[%c0_21, %c0_22] : memref<384x256xbf16, #tpu.memory_space<vmem>>, vector<384x256xbf16>
    %cst_23 = arith.constant dense<0.000000e+00> : vector<8x256xf32>
    %35 = tpu.matmul %33, %34, %cst_23 {dimension_numbers = #tpu.dot_dimension_numbers<[1], [0], [0], [1], [0, 0, 1, 1], [], []>} : vector<8x384xbf16>, vector<384x256xbf16>, vector<8x256xf32> -> vector<8x256xf32>
    %c0_24 = arith.constant 0 : index
    %c0_25 = arith.constant 0 : index
    %36 = vector.load %arg9[%c0_24, %c0_25] : memref<1x256xf32, #tpu.memory_space<vmem>>, vector<1x256xf32>
    %37 = vector.broadcast %36 : vector<1x256xf32> to vector<8x256xf32>
    %38 = arith.addf %35, %37 : vector<8x256xf32>
    %cst_26 = arith.constant 0.000000e+00 : f32
    %39 = vector.broadcast %cst_26 : f32 to vector<8x256xf32>
    %40 = arith.cmpf ogt, %38, %39 : vector<8x256xf32>
    %cst_27 = arith.constant 0.00999999977 : f32
    %41 = vector.broadcast %cst_27 : f32 to vector<8x256xf32>
    %42 = arith.mulf %41, %38 : vector<8x256xf32>
    %43 = arith.select %40, %38, %42 : vector<8x256xi1>, vector<8x256xf32>
    %44 = arith.truncf %43 : vector<8x256xf32> to vector<8x256xbf16>
    %c0_28 = arith.constant 0 : index
    %c0_29 = arith.constant 0 : index
    %45 = vector.load %arg10[%c0_28, %c0_29] : memref<256x128xbf16, #tpu.memory_space<vmem>>, vector<256x128xbf16>
    %cst_30 = arith.constant dense<0.000000e+00> : vector<8x128xf32>
    %46 = tpu.matmul %44, %45, %cst_30 {dimension_numbers = #tpu.dot_dimension_numbers<[1], [0], [0], [1], [0, 0, 1, 1], [], []>} : vector<8x256xbf16>, vector<256x128xbf16>, vector<8x128xf32> -> vector<8x128xf32>
    %c0_31 = arith.constant 0 : index
    %c0_32 = arith.constant 0 : index
    %47 = vector.load %arg11[%c0_31, %c0_32] : memref<1x128xf32, #tpu.memory_space<vmem>>, vector<1x128xf32>
    %48 = vector.broadcast %47 : vector<1x128xf32> to vector<8x128xf32>
    %49 = arith.addf %46, %48 : vector<8x128xf32>
    %cst_33 = arith.constant 0.000000e+00 : f32
    %50 = vector.broadcast %cst_33 : f32 to vector<8x128xf32>
    %51 = arith.cmpf ogt, %49, %50 : vector<8x128xf32>
    %cst_34 = arith.constant 0.00999999977 : f32
    %52 = vector.broadcast %cst_34 : f32 to vector<8x128xf32>
    %53 = arith.mulf %52, %49 : vector<8x128xf32>
    %54 = arith.select %51, %49, %53 : vector<8x128xi1>, vector<8x128xf32>
    %55 = arith.truncf %54 : vector<8x128xf32> to vector<8x128xbf16>
    %c0_35 = arith.constant 0 : index
    %c0_36 = arith.constant 0 : index
    %56 = vector.load %arg12[%c0_35, %c0_36] : memref<128x128xbf16, #tpu.memory_space<vmem>>, vector<128x128xbf16>
    %cst_37 = arith.constant dense<0.000000e+00> : vector<8x128xf32>
    %57 = tpu.matmul %55, %56, %cst_37 {dimension_numbers = #tpu.dot_dimension_numbers<[1], [0], [0], [1], [0, 0, 1, 1], [], []>} : vector<8x128xbf16>, vector<128x128xbf16>, vector<8x128xf32> -> vector<8x128xf32>
    %c0_38 = arith.constant 0 : index
    %c0_39 = arith.constant 0 : index
    %58 = vector.load %arg13[%c0_38, %c0_39] : memref<1x128xf32, #tpu.memory_space<vmem>>, vector<1x128xf32>
    %59 = vector.broadcast %58 : vector<1x128xf32> to vector<8x128xf32>
    %60 = arith.addf %57, %59 : vector<8x128xf32>
    %61 = tpu.iota {dimensions = array<i32: 1>} : vector<8x128xi32>
    %c10_i32 = arith.constant 10 : i32
    %62 = vector.broadcast %c10_i32 : i32 to vector<8x128xi32>
    %63 = arith.cmpi slt, %61, %62 : vector<8x128xi32>
    %cst_40 = arith.constant -1.000000e+30 : f32
    %64 = vector.broadcast %cst_40 : f32 to vector<8x128xf32>
    %65 = arith.select %63, %60, %64 : vector<8x128xi1>, vector<8x128xf32>
    %cst_41 = arith.constant dense<0xFF800000> : vector<8xf32>
    %66 = vector.multi_reduction <maximumf>, %65, %cst_41 [1] : vector<8x128xf32> to vector<8xf32>
    %67 = vector.shape_cast %66 : vector<8xf32> to vector<8x1xf32>
    %68 = vector.broadcast %67 : vector<8x1xf32> to vector<8x128xf32>
    %69 = arith.subf %65, %68 : vector<8x128xf32>
    %70 = math.exp %69 : vector<8x128xf32>
    %cst_42 = arith.constant dense<0.000000e+00> : vector<8xf32>
    %71 = vector.multi_reduction <add>, %70, %cst_42 [1] : vector<8x128xf32> to vector<8xf32>
    %72 = vector.shape_cast %71 : vector<8xf32> to vector<8x1xf32>
    %73 = math.log %72 : vector<8x1xf32>
    %74 = vector.broadcast %73 : vector<8x1xf32> to vector<8x128xf32>
    %75 = arith.subf %69, %74 : vector<8x128xf32>
    %c0_43 = arith.constant 0 : index
    %c0_44 = arith.constant 0 : index
    %76 = vector.load %arg14[%c0_43, %c0_44] : memref<8x128xf32, #tpu.memory_space<vmem>>, vector<8x128xf32>
    tpu.vector_store %arg14[%c0_43, %c0_44], %75 {strides = array<i32>} : memref<8x128xf32, #tpu.memory_space<vmem>>, vector<8x128xf32>,
    return
  }
  func.func @transform_0(%arg0: i32) -> (i32, i32) {
    %c0_i32 = arith.constant 0 : i32
    %c0_i32_0 = arith.constant 0 : i32
    return %arg0, %c0_i32 : i32, i32
  }
  func.func @transform_1(%arg0: i32) -> (i32, i32) {
    %c0_i32 = arith.constant 0 : i32
    %c0_i32_0 = arith.constant 0 : i32
    %c0_i32_1 = arith.constant 0 : i32
    return %c0_i32, %c0_i32_0 : i32, i32
  }
  func.func @transform_2(%arg0: i32) -> (i32, i32) {
    %c0_i32 = arith.constant 0 : i32
    %c0_i32_0 = arith.constant 0 : i32
    %c0_i32_1 = arith.constant 0 : i32
    return %c0_i32, %c0_i32_0 : i32, i32
  }
  func.func @transform_3(%arg0: i32) -> (i32, i32) {
    %c0_i32 = arith.constant 0 : i32
    %c0_i32_0 = arith.constant 0 : i32
    %c0_i32_1 = arith.constant 0 : i32
    return %c0_i32, %c0_i32_0 : i32, i32
  }
  func.func @transform_4(%arg0: i32) -> (i32, i32) {
    %c0_i32 = arith.constant 0 : i32
    %c0_i32_0 = arith.constant 0 : i32
    %c0_i32_1 = arith.constant 0 : i32
    return %c0_i32, %c0_i32_0 : i32, i32
  }
  func.func @transform_5(%arg0: i32) -> (i32, i32) {
    %c0_i32 = arith.constant 0 : i32
    %c0_i32_0 = arith.constant 0 : i32
    %c0_i32_1 = arith.constant 0 : i32
    return %c0_i32, %c0_i32_0 : i32, i32
  }
  func.func @transform_6(%arg0: i32) -> (i32, i32) {
    %c0_i32 = arith.constant 0 : i32
    %c0_i32_0 = arith.constant 0 : i32
    %c0_i32_1 = arith.constant 0 : i32
    return %c0_i32, %c0_i32_0 : i32, i32
  }
  func.func @transform_7(%arg0: i32) -> (i32, i32) {
    %c0_i32 = arith.constant 0 : i32
    %c0_i32_0 = arith.constant 0 : i32
    %c0_i32_1 = arith.constant 0 : i32
    return %c0_i32, %c0_i32_0 : i32, i32
  }
  func.func @transform_8(%arg0: i32) -> (i32, i32) {
    %c0_i32 = arith.constant 0 : i32
    %c0_i32_0 = arith.constant 0 : i32
    %c0_i32_1 = arith.constant 0 : i32
    return %c0_i32, %c0_i32_0 : i32, i32
  }
  func.func @transform_9(%arg0: i32) -> (i32, i32) {
    %c0_i32 = arith.constant 0 : i32
    %c0_i32_0 = arith.constant 0 : i32
    %c0_i32_1 = arith.constant 0 : i32
    return %c0_i32, %c0_i32_0 : i32, i32
  }
  func.func @transform_10(%arg0: i32) -> (i32, i32) {
    %c0_i32 = arith.constant 0 : i32
    %c0_i32_0 = arith.constant 0 : i32
    %c0_i32_1 = arith.constant 0 : i32
    return %c0_i32, %c0_i32_0 : i32, i32
  }
  func.func @transform_11(%arg0: i32) -> (i32, i32) {
    %c0_i32 = arith.constant 0 : i32
    %c0_i32_0 = arith.constant 0 : i32
    %c0_i32_1 = arith.constant 0 : i32
    return %c0_i32, %c0_i32_0 : i32, i32
  }
  func.func @transform_12(%arg0: i32) -> (i32, i32) {
    %c0_i32 = arith.constant 0 : i32
    %c0_i32_0 = arith.constant 0 : i32
    %c0_i32_1 = arith.constant 0 : i32
    return %c0_i32, %c0_i32_0 : i32, i32
  }
  func.func @transform_13(%arg0: i32) -> (i32, i32) {
    %c0_i32 = arith.constant 0 : i32
    %c0_i32_0 = arith.constant 0 : i32
    return %arg0, %c0_i32 : i32, i32
  }
}

</mosaic_0001>

<bundles_post_ra>
// kernel: tpu_custom_call.1
= control target key start
LH: loop header
LB: loop body
LE: loop exit
PB: predicated region body
PF: predicated region fallthrough
CT: control target
= control target key end

     0   :  { %18 = vsyncpa [#allocation3], 0  ;;  %s4353_s0 = inlined_call_operand.hbm [shape: bf16[8,128], index: 0, kind: input, shape index: {}]   ;;  %s4354_s1 = inlined_call_operand.hbm [shape: bf16[128,512], index: 1, kind: input, shape index: {}]   ;;  %s4355_s2 = inlined_call_operand.vmem [shape: f32[1,512], index: 2, kind: input, shape index: {}]   ;;  %s4356_s3 = inlined_call_operand.hbm [shape: bf16[512,512], index: 3, kind: input, shape index: {}]   ;;  %s4357_s4 = inlined_call_operand.vmem [shape: f32[1,512], index: 4, kind: input, shape index: {}]   ;;  %s4358_s5 = inlined_call_operand.hbm [shape: bf16[512,384], index: 5, kind: input, shape index: {}]   ;;  %s4359_s6 = inlined_call_operand.vmem [shape: f32[1,384], index: 6, kind: input, shape index: {}]   ;;  %s4360_s7 = inlined_call_operand.hbm [shape: bf16[384,256], index: 7, kind: input, shape index: {}]   ;;  %s4361_s8 = inlined_call_operand.vmem [shape: f32[1,256], index: 8, kind: input, shape index: {}]   ;;  %s4362_s9 = inlined_call_operand.hbm [shape: bf16[256,128], index: 9, kind: input, shape index: {}]   ;;  %s4363_s10 = inlined_call_operand.vmem [shape: f32[1,128], index: 10, kind: input, shape index: {}]   ;;  %s4364_s11 = inlined_call_operand.hbm [shape: bf16[128,128], index: 11, kind: input, shape index: {}]   ;;  %s4365_s12 = inlined_call_operand.vmem [shape: f32[1,128], index: 12, kind: input, shape index: {}]   ;;  %s4366_s13 = inlined_call_operand.hbm [shape: f32[8,128], index: 13, kind: output, shape index: {}]  }
   0x1   :  { %19 = vsyncpa [#allocation6], 0 }
   0x2   :  { %20 = vsyncpa [#allocation9], 0 }
   0x3   :  { %21 = vsyncpa [#allocation12], 0 }
   0x4   :  { %22 = vsyncpa [#allocation4], 0  ;;  %s4088_s25 = smov [#allocation5]   ;;  %s3902_s29 = scalar_lea.hbm %s4354_s1, 4096 }
   0x5   :  { %s38_s26 = sshll.u32 %s4088_s25, 4  ;;  %p3903_p0 = scmp.ne.s32.totalorder %s4354_s1, %s3902_s29  ;;  %s39_s26 = int_to_ptr.vmem [resolvable:$true] %s38_s26 }
   0x6   :  { %p3906_p1 = scmp.lt.u32.totalorder %s3902_s29, %s4354_s1 }
   0x8   :  { %p3908_p2 = pnand %p3906_p1, %p3903_p0 }
   0xa   :  { %3911 = shalt.err (!%p3908_p2)
}
   0xb   :  { %s3912_s17 = scalar_lea.vmem %s39_s26, 4096  ;;  %p3917_p4 = scmp.lt.s32.totalorder %s39_s26, %s39_s26 }
   0xc   :  { %p3913_p3 = scmp.ne.s32.totalorder %s39_s26, %s3912_s17  ;;  %p3918_p5 = scmp.lt.s32.totalorder %s3912_s17, %s3912_s17 }
   0xe   :  { %p3919_p6 = por %p3918_p5, %p3917_p4 }
  0x10   :  { %p3920_p7 = pnand %p3919_p6, %p3913_p3 }
  0x12   :  { %3923 = shalt.err (!%p3920_p7)
}
  0x13   :  { %s4089_s18 = smov 256   ;;  %s4090_s19 = smov 16  }
  0x14   :  { %44 = dma.hbm_to_vmem [thread:$0]  %s4354_s1, 4096, %s39_s26, [#allocation6], %s4089_s18, %s4089_s18, %s4090_s19  }
  0x15   :  { %s4091_s22 = smov [#allocation8]   ;;  %s3924_s27 = scalar_lea.hbm %s4358_s5, 12288 }
  0x16   :  { %s66_s23 = sshll.u32 %s4091_s22, 4  ;;  %p3925_p8 = scmp.ne.s32.totalorder %s4358_s5, %s3924_s27  ;;  %s67_s23 = int_to_ptr.vmem [resolvable:$true] %s66_s23 }
  0x17   :  { %p3928_p9 = scmp.lt.u32.totalorder %s3924_s27, %s4358_s5 }
  0x19   :  { %p3930_p10 = pnand %p3928_p9, %p3925_p8 }
  0x1b   :  { %3933 = shalt.err (!%p3930_p10)
}
  0x1c   :  { %s3934_s15 = scalar_lea.vmem %s67_s23, 12288  ;;  %p3939_p12 = scmp.lt.s32.totalorder %s67_s23, %s67_s23 }
  0x1d   :  { %p3935_p11 = scmp.ne.s32.totalorder %s67_s23, %s3934_s15  ;;  %p3940_p13 = scmp.lt.s32.totalorder %s3934_s15, %s3934_s15 }
  0x1f   :  { %p3941_p0 = por %p3940_p13, %p3939_p12 }
  0x21   :  { %p3942_p1 = pnand %p3941_p0, %p3935_p11 }
  0x23   :  { %3945 = shalt.err (!%p3942_p1)
}
  0x24   :  { %s4092_s1 = smov 192   ;;  %s4093_s26 = smov 12  }
  0x25   :  { %72 = dma.hbm_to_vmem [thread:$0]  %s4358_s5, 12288, %s67_s23, [#allocation9], %s4092_s1, %s4092_s1, %s4093_s26  }
  0x26   :  { %s4094_s20 = smov [#allocation11]   ;;  %s3946_s25 = scalar_lea.hbm %s4362_s9, 2048 }
  0x27   :  { %s94_s21 = sshll.u32 %s4094_s20, 4  ;;  %p3947_p2 = scmp.ne.s32.totalorder %s4362_s9, %s3946_s25  ;;  %s95_s21 = int_to_ptr.vmem [resolvable:$true] %s94_s21 }
  0x28   :  { %p3950_p3 = scmp.lt.u32.totalorder %s3946_s25, %s4362_s9 }
  0x2a   :  { %p3952_p4 = pnand %p3950_p3, %p3947_p2 }
  0x2c   :  { %3955 = shalt.err (!%p3952_p4)
}
  0x2d   :  { %s3956_s14 = scalar_lea.vmem %s95_s21, 2048  ;;  %p3961_p6 = scmp.lt.s32.totalorder %s95_s21, %s95_s21 }
  0x2e   :  { %p3957_p5 = scmp.ne.s32.totalorder %s95_s21, %s3956_s14  ;;  %p3962_p7 = scmp.lt.s32.totalorder %s3956_s14, %s3956_s14 }
  0x30   :  { %p3963_p8 = por %p3962_p7, %p3961_p6 }
  0x32   :  { %p3964_p9 = pnand %p3963_p8, %p3957_p5 }
  0x34   :  { %3967 = shalt.err (!%p3964_p9)
}
  0x35   :  { %s4095_s5 = smov 64   ;;  %s4096_s23 = smov 4  }
  0x36   :  { %100 = dma.hbm_to_vmem [thread:$0]  %s4362_s9, 2048, %s95_s21, [#allocation12], %s4095_s5, %s4095_s5, %s4096_s23  }
  0x37   :  { %s4097_s26 = smov [#allocation2]   ;;  %s4098_s17 = smov [#allocation7]  }
  0x38   :  { %s29_s16 = sshll.u32 %s4097_s26, 4  ;;  %s52_s20 = sshll.u32 %s4098_s17, 4  ;;  %s30_s16 = int_to_ptr.vmem [resolvable:$true] %s29_s16  ;;  %s53_s20 = int_to_ptr.vmem [resolvable:$true] %s52_s20 }
  0x39   :  { %s3968_s25 = scalar_lea.hbm %s4353_s0, 64 }
  0x3a   :  { %p3969_p10 = scmp.ne.s32.totalorder %s4353_s0, %s3968_s25  ;;  %p3972_p11 = scmp.lt.u32.totalorder %s3968_s25, %s4353_s0 }
  0x3c   :  { %p3974_p12 = pnand %p3972_p11, %p3969_p10 }
  0x3e   :  { %3977 = shalt.err (!%p3974_p12)
}
  0x3f   :  { %s3978_s9 = scalar_lea.vmem %s30_s16, 64  ;;  %p3983_p0 = scmp.lt.s32.totalorder %s30_s16, %s30_s16 }
  0x40   :  { %p3979_p13 = scmp.ne.s32.totalorder %s30_s16, %s3978_s9  ;;  %p3984_p1 = scmp.lt.s32.totalorder %s3978_s9, %s3978_s9 }
  0x42   :  { %p3985_p2 = por %p3984_p1, %p3983_p0 }
  0x44   :  { %p3986_p3 = pnand %p3985_p2, %p3979_p13 }
  0x46   :  { %3989 = shalt.err (!%p3986_p3)
}
  0x47   :  { %32 = dma.hbm_to_vmem [thread:$0]  %s4353_s0, 64, %s30_s16, [#allocation3]  }
  0x48   :  { %s3990_s26 = scalar_lea.hbm %s4356_s3, 16384 }
  0x49   :  { %p3991_p4 = scmp.ne.s32.totalorder %s4356_s3, %s3990_s26  ;;  %p3994_p5 = scmp.lt.u32.totalorder %s3990_s26, %s4356_s3 }
  0x4b   :  { %p3996_p6 = pnand %p3994_p5, %p3991_p4 }
  0x4d   :  { %3999 = shalt.err (!%p3996_p6)
}
  0x4e   :  { %s4000_s27 = scalar_lea.vmem %s53_s20, 16384  ;;  %p4005_p8 = scmp.lt.s32.totalorder %s53_s20, %s53_s20 }
  0x4f   :  { %p4001_p7 = scmp.ne.s32.totalorder %s53_s20, %s4000_s27  ;;  %p4006_p9 = scmp.lt.s32.totalorder %s4000_s27, %s4000_s27 }
  0x51   :  { %p4007_p10 = por %p4006_p9, %p4005_p8 }
  0x53   :  { %p4008_p11 = pnand %p4007_p10, %p4001_p7 }
  0x55   :  { %4011 = shalt.err (!%p4008_p11)
}
  0x56   :  { %58 = dma.hbm_to_vmem [thread:$0]  %s4356_s3, 16384, %s53_s20, [#allocation6], %s4089_s18, %s4089_s18, %s4090_s19  }
  0x57   :  { %s4099_s28 = smov [#allocation10]   ;;  %s4012_s21 = scalar_lea.hbm %s4360_s7, 6144 }
  0x58   :  { %s80_s29 = sshll.u32 %s4099_s28, 4  ;;  %p4013_p12 = scmp.ne.s32.totalorder %s4360_s7, %s4012_s21  ;;  %s81_s29 = int_to_ptr.vmem [resolvable:$true] %s80_s29 }
  0x59   :  { %p4016_p13 = scmp.lt.u32.totalorder %s4012_s21, %s4360_s7 }
  0x5b   :  { %p4018_p0 = pnand %p4016_p13, %p4013_p12 }
  0x5d   :  { %4021 = shalt.err (!%p4018_p0)
}
  0x5e   :  { %s4022_s17 = scalar_lea.vmem %s81_s29, 6144  ;;  %p4027_p2 = scmp.lt.s32.totalorder %s81_s29, %s81_s29 }
  0x5f   :  { %p4023_p1 = scmp.ne.s32.totalorder %s81_s29, %s4022_s17  ;;  %p4028_p3 = scmp.lt.s32.totalorder %s4022_s17, %s4022_s17 }
  0x61   :  { %p4029_p4 = por %p4028_p3, %p4027_p2 }
  0x63   :  { %p4030_p5 = pnand %p4029_p4, %p4023_p1 }
  0x65   :  { %4033 = shalt.err (!%p4030_p5)
}
  0x66   :  { %s4100_s3 = smov 128   ;;  %s4101_s18 = smov 8  }
  0x67   :  { %86 = dma.hbm_to_vmem [thread:$0]  %s4360_s7, 6144, %s81_s29, [#allocation9], %s4100_s3, %s4100_s3, %s4101_s18  }
  0x68   :  { %s4102_s22 = smov [#allocation13]   ;;  %s4034_s0 = scalar_lea.hbm %s4364_s11, 1024 }
  0x69   :  { %s108_s24 = sshll.u32 %s4102_s22, 4  ;;  %p4035_p6 = scmp.ne.s32.totalorder %s4364_s11, %s4034_s0  ;;  %s109_s24 = int_to_ptr.vmem [resolvable:$true] %s108_s24 }
  0x6a   :  { %p4038_p7 = scmp.lt.u32.totalorder %s4034_s0, %s4364_s11 }
  0x6c   :  { %p4040_p8 = pnand %p4038_p7, %p4035_p6 }
  0x6e   :  { %4043 = shalt.err (!%p4040_p8)
}
  0x6f   :  { %s4044_s21 = scalar_lea.vmem %s109_s24, 1024  ;;  %p4049_p10 = scmp.lt.s32.totalorder %s109_s24, %s109_s24 }
  0x70   :  { %p4045_p9 = scmp.ne.s32.totalorder %s109_s24, %s4044_s21  ;;  %p4050_p11 = scmp.lt.s32.totalorder %s4044_s21, %s4044_s21 }
  0x72   :  { %p4051_p12 = por %p4050_p11, %p4049_p10 }
  0x74   :  { %p4052_p13 = pnand %p4051_p12, %p4045_p9 }
  0x76   :  { %4055 = shalt.err (!%p4052_p13)
}
  0x77   :  { %114 = dma.hbm_to_vmem [thread:$0]  %s4364_s11, 1024, %s109_s24, [#allocation12], %s4095_s5, %s4095_s5, %s4096_s23  }
  0x78   :  { %4078 = dma.done.wait [#allocation3], 64  }
  0x79   :  { %4079 = vsyncadd [#allocation3], 4294967232 }
  0x7a   :  { %4080 = dma.done.wait [#allocation6], 20480  }
  0x7b   :  { %4081 = vsyncadd [#allocation6], 4294946816 }
  0x7c   :  { %4082 = dma.done.wait [#allocation9], 18432  }
  0x7d   :  { %4083 = vsyncadd [#allocation9], 4294948864 }
  0x7e   :  { %4084 = dma.done.wait [#allocation12], 3072  }
  0x7f   :  { %4085 = vsyncadd [#allocation12], 4294964224  ;;  %v4103_v0 = vmov 0   ;;  %v3434_v1 = vld [vmem:[#allocation5 + $0x4] ss:$16 sps:$4 sm:$0xff]   ;;  %vm4105_vm13 = vmmov 0  }
  0x80   :  { %386 = vmatprep.mubr.bf16.mxu0 %v4103_v0  ;;  %427 = vmatprep.mubr.bf16.mxu1 %v4103_v0  ;;  %v3436_v2 = vld [vmem:[#allocation5] ss:$16 sps:$4 sm:$0xff]   ;;  %v3437_v3 = vld [vmem:[#allocation5 + $0x24] ss:$16 sps:$4 sm:$0xff]   ;;  %v3458_v10 = vld [vmem:[#allocation5 + $0xc] ss:$16 sps:$4 sm:$0xff]  }
  0x81   :  { %354 = vmatprep.subr.bf16.mxu0 %v3434_v1  ;;  %v3439_v4 = vld [vmem:[#allocation5 + $0x20] ss:$16 sps:$4 sm:$0xff]   ;;  %v3440_v5 = vld [vmem:[#allocation5 + $0x44] ss:$16 sps:$4 sm:$0xff]   ;;  %v3460_v11 = vld [vmem:[#allocation5 + $0x8] ss:$16 sps:$4 sm:$0xff]   ;;  %395 = vmatprep.subr.bf16.mxu1 %v3458_v10 }
  0x82   :  { %355 = vmatpush1.bf16.msra.mxu0 %v3436_v2  ;;  %v3442_v6 = vld [vmem:[#allocation5 + $0x40] ss:$16 sps:$4 sm:$0xff]   ;;  %v3443_v7 = vld [vmem:[#allocation5 + $0x64] ss:$16 sps:$4 sm:$0xff]   ;;  %v3461_v12 = vld [vmem:[#allocation5 + $0x2c] ss:$16 sps:$4 sm:$0xff]   ;;  %396 = vmatpush1.bf16.msra.mxu1 %v3460_v11 }
  0x83   :  { %356 = vmatprep.subr.bf16.mxu0 %v3437_v3  ;;  %v3445_v8 = vld [vmem:[#allocation5 + $0x60] ss:$16 sps:$4 sm:$0xff]   ;;  %v3446_v9 = vld [vmem:[#allocation5 + $0x84] ss:$16 sps:$4 sm:$0xff]   ;;  %v3463_v14 = vld [vmem:[#allocation5 + $0x28] ss:$16 sps:$4 sm:$0xff]   ;;  %397 = vmatprep.subr.bf16.mxu1 %v3461_v12 }
  0x84   :  { %v3448_v13 = vld [vmem:[#allocation5 + $0x80] ss:$16 sps:$4 sm:$0xff]   ;;  %v3464_v15 = vld [vmem:[#allocation5 + $0x4c] ss:$16 sps:$4 sm:$0xff]   ;;  %v3449_v16 = vld [vmem:[#allocation5 + $0xa4] ss:$16 sps:$4 sm:$0xff]  }
  0x85   :  { %v3451_v17 = vld [vmem:[#allocation5 + $0xa0] ss:$16 sps:$4 sm:$0xff]   ;;  %v3466_v18 = vld [vmem:[#allocation5 + $0x48] ss:$16 sps:$4 sm:$0xff]   ;;  %v3467_v19 = vld [vmem:[#allocation5 + $0x6c] ss:$16 sps:$4 sm:$0xff]  }
  0x86   :  { %357 = vmatpush1.bf16.msra.mxu0 %v3439_v4  ;;  %398 = vmatpush1.bf16.msra.mxu1 %v3463_v14  ;;  %v3452_v20 = vld [vmem:[#allocation5 + $0xc4] ss:$16 sps:$4 sm:$0xff]   ;;  %v3454_v21 = vld [vmem:[#allocation5 + $0xc0] ss:$16 sps:$4 sm:$0xff]   ;;  %v3469_v22 = vld [vmem:[#allocation5 + $0x68] ss:$16 sps:$4 sm:$0xff]  }
  0x87   :  { %358 = vmatprep.subr.bf16.mxu0 %v3440_v5  ;;  %399 = vmatprep.subr.bf16.mxu1 %v3464_v15  ;;  %v3470_v23 = vld [vmem:[#allocation5 + $0x8c] ss:$16 sps:$4 sm:$0xff]   ;;  %v3455_v24 = vld [vmem:[#allocation5 + $0xe4] ss:$16 sps:$4 sm:$0xff]   ;;  %v3457_v25 = vld [vmem:[#allocation5 + $0xe0] ss:$16 sps:$4 sm:$0xff]  }
  0x88   :  { %v3472_v26 = vld [vmem:[#allocation5 + $0x88] ss:$16 sps:$4 sm:$0xff]   ;;  %v3473_v27 = vld [vmem:[#allocation5 + $0xac] ss:$16 sps:$4 sm:$0xff]   ;;  %v3484_v28 = vld [vmem:[#allocation7 + $0x4] ss:$16 sps:$4 sm:$0xff]  }
  0x89   :  { %v139_v29 = vld [vmem:[#allocation2] sm:$0xf]  ;;  %v3475_v30 = vld [vmem:[#allocation5 + $0xa8] ss:$16 sps:$4 sm:$0xff]   ;;  %v3482_v32 = vld [vmem:[#allocation7] ss:$16 sps:$4 sm:$0xff]  }
  0x8a   :  { %359 = vmatpush1.bf16.msra.mxu0 %v3442_v6  ;;  %400 = vmatpush1.bf16.msra.mxu1 %v3466_v18  ;;  %v3476_v31 = vld [vmem:[#allocation5 + $0xcc] ss:$16 sps:$4 sm:$0xff]   ;;  %v3490_v33 = vld [vmem:[#allocation7 + $0x24] ss:$16 sps:$4 sm:$0xff]   ;;  %v3478_v34 = vld [vmem:[#allocation5 + $0xc8] ss:$16 sps:$4 sm:$0xff]  }
  0x8b   :  { %360 = vmatprep.subr.bf16.mxu0 %v3443_v7  ;;  %401 = vmatprep.subr.bf16.mxu1 %v3467_v19  ;;  %v3479_v35 = vld [vmem:[#allocation5 + $0xec] ss:$16 sps:$4 sm:$0xff]   ;;  %v3488_v36 = vld [vmem:[#allocation7 + $0x20] ss:$16 sps:$4 sm:$0xff]   ;;  %v3496_v37 = vld [vmem:[#allocation7 + $0x44] ss:$16 sps:$4 sm:$0xff]  }
  0x8c   :  { %v3481_v38 = vld [vmem:[#allocation5 + $0xe8] ss:$16 sps:$4 sm:$0xff]   ;;  %v3487_v39 = vld [vmem:[#allocation7 + $0xc] ss:$16 sps:$4 sm:$0xff]   ;;  %v3494_v40 = vld [vmem:[#allocation7 + $0x40] ss:$16 sps:$4 sm:$0xff]  }
  0x8d   :  { %v3502_v41 = vld [vmem:[#allocation7 + $0x64] ss:$16 sps:$4 sm:$0xff]   ;;  %v3485_v42 = vld [vmem:[#allocation7 + $0x8] ss:$16 sps:$4 sm:$0xff]   ;;  %v3493_v43 = vld [vmem:[#allocation7 + $0x2c] ss:$16 sps:$4 sm:$0xff]  }
  0x8e   :  { %361 = vmatpush1.bf16.msra.mxu0 %v3445_v8  ;;  %402 = vmatpush1.bf16.msra.mxu1 %v3469_v22  ;;  %v3500_v44 = vld [vmem:[#allocation7 + $0x60] ss:$16 sps:$4 sm:$0xff]   ;;  %v3508_v45 = vld [vmem:[#allocation7 + $0x84] ss:$16 sps:$4 sm:$0xff]   ;;  %v3491_v46 = vld [vmem:[#allocation7 + $0x28] ss:$16 sps:$4 sm:$0xff]  }
  0x8f   :  { %362 = vmatprep.subr.bf16.mxu0 %v3446_v9  ;;  %403 = vmatprep.subr.bf16.mxu1 %v3470_v23  ;;  %v3499_v47 = vld [vmem:[#allocation7 + $0x4c] ss:$16 sps:$4 sm:$0xff]   ;;  %v3506_v48 = vld [vmem:[#allocation7 + $0x80] ss:$16 sps:$4 sm:$0xff]   ;;  %v3514_v49 = vld [vmem:[#allocation7 + $0xa4] ss:$16 sps:$4 sm:$0xff]  }
  0x90   :  { %v3497_v50 = vld [vmem:[#allocation7 + $0x48] ss:$16 sps:$4 sm:$0xff]   ;;  %v3505_v51 = vld [vmem:[#allocation7 + $0x6c] ss:$16 sps:$4 sm:$0xff]   ;;  %v3512_v52 = vld [vmem:[#allocation7 + $0xa0] ss:$16 sps:$4 sm:$0xff]  }
  0x91   :  { %v3520_v53 = vld [vmem:[#allocation7 + $0xc4] ss:$16 sps:$4 sm:$0xff]   ;;  %v3503_v54 = vld [vmem:[#allocation7 + $0x68] ss:$16 sps:$4 sm:$0xff]   ;;  %v3511_v55 = vld [vmem:[#allocation7 + $0x8c] ss:$16 sps:$4 sm:$0xff]  }
  0x92   :  { %363 = vmatpush1.bf16.msra.mxu0 %v3448_v13  ;;  %404 = vmatpush1.bf16.msra.mxu1 %v3472_v26  ;;  %v3518_v56 = vld [vmem:[#allocation7 + $0xc0] ss:$16 sps:$4 sm:$0xff]   ;;  %v3526_v57 = vld [vmem:[#allocation7 + $0xe4] ss:$16 sps:$4 sm:$0xff]   ;;  %v3509_v58 = vld [vmem:[#allocation7 + $0x88] ss:$16 sps:$4 sm:$0xff]  }
  0x93   :  { %364 = vmatprep.subr.bf16.mxu0 %v3449_v16  ;;  %405 = vmatprep.subr.bf16.mxu1 %v3473_v27  ;;  %v3517_v59 = vld [vmem:[#allocation7 + $0xac] ss:$16 sps:$4 sm:$0xff]   ;;  %v3524_v60 = vld [vmem:[#allocation7 + $0xe0] ss:$16 sps:$4 sm:$0xff]   ;;  %v3532_v61 = vld [vmem:[#allocation7 + $0x104] ss:$16 sps:$4 sm:$0xff]  }
  0x94   :  { %v3515_v62 = vld [vmem:[#allocation7 + $0xa8] ss:$16 sps:$4 sm:$0xff]   ;;  %v3523_v63 = vld [vmem:[#allocation7 + $0xcc] ss:$16 sps:$4 sm:$0xff]   ;;  %v3530_v1 = vld [vmem:[#allocation7 + $0x100] ss:$16 sps:$4 sm:$0xff]  }
  0x95   :  { %v3538_v2 = vld [vmem:[#allocation7 + $0x124] ss:$16 sps:$4 sm:$0xff]   ;;  %v3521_v3 = vld [vmem:[#allocation7 + $0xc8] ss:$16 sps:$4 sm:$0xff]   ;;  %v3529_v4 = vld [vmem:[#allocation7 + $0xec] ss:$16 sps:$4 sm:$0xff]  }
  0x96   :  { %365 = vmatpush1.bf16.msra.mxu0 %v3451_v17  ;;  %406 = vmatpush1.bf16.msra.mxu1 %v3475_v30  ;;  %v3536_v5 = vld [vmem:[#allocation7 + $0x120] ss:$16 sps:$4 sm:$0xff]   ;;  %v3544_v6 = vld [vmem:[#allocation7 + $0x144] ss:$16 sps:$4 sm:$0xff]   ;;  %v3527_v7 = vld [vmem:[#allocation7 + $0xe8] ss:$16 sps:$4 sm:$0xff]  }
  0x97   :  { %366 = vmatprep.subr.bf16.mxu0 %v3452_v20  ;;  %407 = vmatprep.subr.bf16.mxu1 %v3476_v31  ;;  %v3535_v8 = vld [vmem:[#allocation7 + $0x10c] ss:$16 sps:$4 sm:$0xff]   ;;  %v3542_v9 = vld [vmem:[#allocation7 + $0x140] ss:$16 sps:$4 sm:$0xff]   ;;  %v3550_v10 = vld [vmem:[#allocation7 + $0x164] ss:$16 sps:$4 sm:$0xff]  }
  0x98   :  { %v3533_v11 = vld [vmem:[#allocation7 + $0x108] ss:$16 sps:$4 sm:$0xff]   ;;  %v3541_v12 = vld [vmem:[#allocation7 + $0x12c] ss:$16 sps:$4 sm:$0xff]   ;;  %v3548_v13 = vld [vmem:[#allocation7 + $0x160] ss:$16 sps:$4 sm:$0xff]  }
  0x99   :  { %v3556_v14 = vld [vmem:[#allocation7 + $0x184] ss:$16 sps:$4 sm:$0xff]   ;;  %v3539_v15 = vld [vmem:[#allocation7 + $0x128] ss:$16 sps:$4 sm:$0xff]   ;;  %v3547_v16 = vld [vmem:[#allocation7 + $0x14c] ss:$16 sps:$4 sm:$0xff]  }
  0x9a   :  { %367 = vmatpush1.bf16.msra.mxu0 %v3454_v21  ;;  %408 = vmatpush1.bf16.msra.mxu1 %v3478_v34  ;;  %v3554_v17 = vld [vmem:[#allocation7 + $0x180] ss:$16 sps:$4 sm:$0xff]   ;;  %v3562_v18 = vld [vmem:[#allocation7 + $0x1a4] ss:$16 sps:$4 sm:$0xff]   ;;  %v3545_v19 = vld [vmem:[#allocation7 + $0x148] ss:$16 sps:$4 sm:$0xff]  }
  0x9b   :  { %368 = vmatprep.subr.bf16.mxu0 %v3455_v24  ;;  %409 = vmatprep.subr.bf16.mxu1 %v3479_v35  ;;  %v3553_v20 = vld [vmem:[#allocation7 + $0x16c] ss:$16 sps:$4 sm:$0xff]   ;;  %v3560_v21 = vld [vmem:[#allocation7 + $0x1a0] ss:$16 sps:$4 sm:$0xff]   ;;  %v3551_v22 = vld [vmem:[#allocation7 + $0x168] ss:$16 sps:$4 sm:$0xff]  }
  0x9c   :  { %v3559_v23 = vld [vmem:[#allocation7 + $0x18c] ss:$16 sps:$4 sm:$0xff]   ;;  %v3557_v24 = vld [vmem:[#allocation7 + $0x188] ss:$16 sps:$4 sm:$0xff]   ;;  %v3568_v27 = vld [vmem:[#allocation7 + $0x1c4] ss:$16 sps:$4 sm:$0xff]  }
  0x9d   :  { %v3563_v26 = vld [vmem:[#allocation7 + $0x1a8] ss:$16 sps:$4 sm:$0xff]   ;;  %v3574_v31 = vld [vmem:[#allocation7 + $0x1e4] ss:$16 sps:$4 sm:$0xff]  }
  0x9e   :  { %369 = vmatpush1.bf16.msra.mxu0 %v3457_v25  ;;  %410 = vmatpush1.bf16.msra.mxu1 %v3481_v38  ;;  %v3565_v25 = vld [vmem:[#allocation7 + $0x1ac] ss:$16 sps:$4 sm:$0xff]   ;;  %v3569_v30 = vld [vmem:[#allocation7 + $0x1c8] ss:$16 sps:$4 sm:$0xff]   ;;  %v3580_v35 = vld [vmem:[#allocation7 + $0x204] ss:$16 sps:$4 sm:$0xff]  }
  0x9f   :  { %1242 = vmatprep.subr.bf16.mxu0 %v3484_v28  ;;  %1324 = vmatprep.subr.bf16.mxu1 %v3487_v39  ;;  %v3571_v28 = vld [vmem:[#allocation7 + $0x1cc] ss:$16 sps:$4 sm:$0xff]   ;;  %v3575_v34 = vld [vmem:[#allocation7 + $0x1e8] ss:$16 sps:$4 sm:$0xff]  }
  0xa1   :  { %387 = vmatmul.mubr.bf16.vlgmr.msra.gmra.mrb[0].mxu0 %v139_v29  ;;  %428 = vmatmul.mubr.bf16.vlgmr.msra.gmra.mrb[0].mxu1 %v139_v29  ;;  %v3566_v29 = vld [vmem:[#allocation7 + $0x1c0] ss:$16 sps:$4 sm:$0xff]  }
  0xa2   :  { %1243 = vmatpush1.bf16.msra.mxu0 %v3482_v32  ;;  %1325 = vmatpush1.bf16.msra.mxu1 %v3485_v42  ;;  %v3577_v32 = vld [vmem:[#allocation7 + $0x1ec] ss:$16 sps:$4 sm:$0xff]  }
  0xa3   :  { %1244 = vmatprep.subr.bf16.mxu0 %v3490_v33  ;;  %1326 = vmatprep.subr.bf16.mxu1 %v3493_v43  ;;  %v3572_v33 = vld [vmem:[#allocation7 + $0x1e0] ss:$16 sps:$4 sm:$0xff]  }
  0xa6   :  { %1245 = vmatpush1.bf16.msra.mxu0 %v3488_v36  ;;  %1327 = vmatpush1.bf16.msra.mxu1 %v3491_v46  ;;  %v3583_v36 = vld [vmem:[#allocation7 + $0x20c] ss:$16 sps:$4 sm:$0xff]  }
  0xa7   :  { %1246 = vmatprep.subr.bf16.mxu0 %v3496_v37  ;;  %1328 = vmatprep.subr.bf16.mxu1 %v3499_v47  ;;  %v174_v37 = vlaneseq }
  0xa9   :  { %v4276_v38 = vshrl.u32 %v174_v37, 7 }
  0xaa   :  { %1247 = vmatpush1.bf16.msra.mxu0 %v3494_v40  ;;  %1329 = vmatpush1.bf16.msra.mxu1 %v3497_v50  ;;  %v4284_v40 = vld [vmem:[%s4355_s2] sm:$0xf] }
  0xab   :  { %1248 = vmatprep.subr.bf16.mxu0 %v3502_v41  ;;  %1330 = vmatprep.subr.bf16.mxu1 %v3505_v51  ;;  %v4279_v39 = vsub.s32 0, %v4276_v38  ;;  %v4287_v41 = vsub.s32 1, %v4276_v38 }
  0xad   :  { %v177_v42 = vrot.slane %v4284_v40, %v4279_v39  ;;  %v181_v43 = vrot.slane %v4284_v40, %v4287_v41 }
  0xae   :  { %1249 = vmatpush1.bf16.msra.mxu0 %v3500_v44  ;;  %1331 = vmatpush1.bf16.msra.mxu1 %v3503_v54 }
  0xaf   :  { %1250 = vmatprep.subr.bf16.mxu0 %v3508_v45  ;;  %1332 = vmatprep.subr.bf16.mxu1 %v3511_v55 }
  0xb2   :  { %1251 = vmatpush1.bf16.msra.mxu0 %v3506_v48  ;;  %1333 = vmatpush1.bf16.msra.mxu1 %v3509_v58 }
  0xb3   :  { %1252 = vmatprep.subr.bf16.mxu0 %v3514_v49  ;;  %1334 = vmatprep.subr.bf16.mxu1 %v3517_v59  ;;  %v3586_v59 = vld [vmem:[#allocation7 + $0x224] ss:$16 sps:$4 sm:$0xff]  }
  0xb6   :  { %1253 = vmatpush1.bf16.msra.mxu0 %v3512_v52  ;;  %1335 = vmatpush1.bf16.msra.mxu1 %v3515_v62  ;;  %v3584_v62 = vld [vmem:[#allocation7 + $0x220] ss:$16 sps:$4 sm:$0xff]  }
  0xb7   :  { %1254 = vmatprep.subr.bf16.mxu0 %v3520_v53  ;;  %1336 = vmatprep.subr.bf16.mxu1 %v3523_v63  ;;  %v188_v53 = vsub.s32 3, %v4276_v38  ;;  %v3587_v63 = vld [vmem:[#allocation7 + $0x228] ss:$16 sps:$4 sm:$0xff]  }
  0xba   :  { %1255 = vmatpush1.bf16.msra.mxu0 %v3518_v56  ;;  %1337 = vmatpush1.bf16.msra.mxu1 %v3521_v3  ;;  %v3578_v56 = vld [vmem:[#allocation7 + $0x200] ss:$16 sps:$4 sm:$0xff]   ;;  %v3595_v3 = vld [vmem:[#allocation7 + $0x24c] ss:$16 sps:$4 sm:$0xff]  }
  0xbb   :  { %1256 = vmatprep.subr.bf16.mxu0 %v3526_v57  ;;  %1338 = vmatprep.subr.bf16.mxu1 %v3529_v4  ;;  %v3581_v57 = vld [vmem:[#allocation7 + $0x208] ss:$16 sps:$4 sm:$0xff]  }
  0xbe   :  { %1257 = vmatpush1.bf16.msra.mxu0 %v3524_v60  ;;  %1339 = vmatpush1.bf16.msra.mxu1 %v3527_v7  ;;  %v3589_v60 = vld [vmem:[#allocation7 + $0x22c] ss:$16 sps:$4 sm:$0xff]   ;;  %v3590_v7 = vld [vmem:[#allocation7 + $0x240] ss:$16 sps:$4 sm:$0xff]  }
  0xbf   :  { %1258 = vmatprep.subr.bf16.mxu0 %v3532_v61  ;;  %1340 = vmatprep.subr.bf16.mxu1 %v3535_v8  ;;  %v189_v61 = vrot.slane %v4284_v40, %v188_v53 }
  0xc2   :  { %1259 = vmatpush1.bf16.msra.mxu0 %v3530_v1  ;;  %1341 = vmatpush1.bf16.msra.mxu1 %v3533_v11  ;;  %v3598_v11 = vld [vmem:[#allocation7 + $0x264] ss:$16 sps:$4 sm:$0xff]  }
  0xc3   :  { %1260 = vmatprep.subr.bf16.mxu0 %v3538_v2  ;;  %1342 = vmatprep.subr.bf16.mxu1 %v3541_v12  ;;  %v3592_v2 = vld [vmem:[#allocation7 + $0x244] ss:$16 sps:$4 sm:$0xff]   ;;  %v3601_v12 = vld [vmem:[#allocation7 + $0x26c] ss:$16 sps:$4 sm:$0xff]  }
  0xc6   :  { %1261 = vmatpush1.bf16.msra.mxu0 %v3536_v5  ;;  %1343 = vmatpush1.bf16.msra.mxu1 %v3539_v15  ;;  %v3596_v15 = vld [vmem:[#allocation7 + $0x260] ss:$16 sps:$4 sm:$0xff]  }
  0xc7   :  { %1262 = vmatprep.subr.bf16.mxu0 %v3544_v6  ;;  %1344 = vmatprep.subr.bf16.mxu1 %v3547_v16  ;;  %v3599_v16 = vld [vmem:[#allocation7 + $0x268] ss:$16 sps:$4 sm:$0xff]  }
  0xca   :  { %1263 = vmatpush1.bf16.msra.mxu0 %v3542_v9  ;;  %1345 = vmatpush1.bf16.msra.mxu1 %v3545_v19  ;;  %v3593_v9 = vld [vmem:[#allocation7 + $0x248] ss:$16 sps:$4 sm:$0xff]   ;;  %v3602_v19 = vld [vmem:[#allocation7 + $0x280] ss:$16 sps:$4 sm:$0xff]  }
  0xcb   :  { %1264 = vmatprep.subr.bf16.mxu0 %v3550_v10  ;;  %1346 = vmatprep.subr.bf16.mxu1 %v3553_v20  ;;  %v3605_v20 = vld [vmem:[#allocation7 + $0x288] ss:$16 sps:$4 sm:$0xff]  }
  0xce   :  { %1265 = vmatpush1.bf16.msra.mxu0 %v3548_v13  ;;  %1347 = vmatpush1.bf16.msra.mxu1 %v3551_v22  ;;  %v3613_v22 = vld [vmem:[#allocation7 + $0x2ac] ss:$16 sps:$4 sm:$0xff]  }
  0xcf   :  { %1266 = vmatprep.subr.bf16.mxu0 %v3556_v14  ;;  %1348 = vmatprep.subr.bf16.mxu1 %v3559_v23  ;;  %v3608_v23 = vld [vmem:[#allocation7 + $0x2a0] ss:$16 sps:$4 sm:$0xff]  }
  0xd2   :  { %1267 = vmatpush1.bf16.msra.mxu0 %v3554_v17  ;;  %1349 = vmatpush1.bf16.msra.mxu1 %v3557_v24  ;;  %v3604_v17 = vld [vmem:[#allocation7 + $0x284] ss:$16 sps:$4 sm:$0xff]   ;;  %v3611_v24 = vld [vmem:[#allocation7 + $0x2a8] ss:$16 sps:$4 sm:$0xff]  }
  0xd3   :  { %1268 = vmatprep.subr.bf16.mxu0 %v3562_v18  ;;  %1350 = vmatprep.subr.bf16.mxu1 %v3565_v25  ;;  %v3607_v18 = vld [vmem:[#allocation7 + $0x28c] ss:$16 sps:$4 sm:$0xff]   ;;  %v3616_v25 = vld [vmem:[#allocation7 + $0x2c4] ss:$16 sps:$4 sm:$0xff]  }
  0xd6   :  { %1269 = vmatpush1.bf16.msra.mxu0 %v3560_v21  ;;  %1351 = vmatpush1.bf16.msra.mxu1 %v3563_v26  ;;  %v3610_v21 = vld [vmem:[#allocation7 + $0x2a4] ss:$16 sps:$4 sm:$0xff]   ;;  %v3619_v26 = vld [vmem:[#allocation7 + $0x2cc] ss:$16 sps:$4 sm:$0xff]  }
  0xd7   :  { %1270 = vmatprep.subr.bf16.mxu0 %v3568_v27  ;;  %1352 = vmatprep.subr.bf16.mxu1 %v3571_v28  ;;  %v3614_v27 = vld [vmem:[#allocation7 + $0x2c0] ss:$16 sps:$4 sm:$0xff]   ;;  %v3617_v28 = vld [vmem:[#allocation7 + $0x2c8] ss:$16 sps:$4 sm:$0xff]  }
  0xda   :  { %1271 = vmatpush1.bf16.msra.mxu0 %v3566_v29  ;;  %1353 = vmatpush1.bf16.msra.mxu1 %v3569_v30  ;;  %v3622_v29 = vld [vmem:[#allocation7 + $0x2e4] ss:$16 sps:$4 sm:$0xff]   ;;  %v3625_v30 = vld [vmem:[#allocation7 + $0x2ec] ss:$16 sps:$4 sm:$0xff]  }
  0xdb   :  { %1272 = vmatprep.subr.bf16.mxu0 %v3574_v31  ;;  %1354 = vmatprep.subr.bf16.mxu1 %v3577_v32  ;;  %v3620_v31 = vld [vmem:[#allocation7 + $0x2e0] ss:$16 sps:$4 sm:$0xff]   ;;  %v3623_v32 = vld [vmem:[#allocation7 + $0x2e8] ss:$16 sps:$4 sm:$0xff]  }
  0xde   :  { %1273 = vmatpush1.bf16.msra.mxu0 %v3572_v33  ;;  %1355 = vmatpush1.bf16.msra.mxu1 %v3575_v34  ;;  %v3628_v33 = vld [vmem:[#allocation7 + $0x304] ss:$16 sps:$4 sm:$0xff]   ;;  %v3631_v34 = vld [vmem:[#allocation7 + $0x30c] ss:$16 sps:$4 sm:$0xff]  }
  0xdf   :  { %1283 = vmatprep.subr.bf16.mxu0 %v3580_v35  ;;  %1365 = vmatprep.subr.bf16.mxu1 %v3583_v36  ;;  %v3626_v35 = vld [vmem:[#allocation7 + $0x300] ss:$16 sps:$4 sm:$0xff]   ;;  %v3629_v36 = vld [vmem:[#allocation7 + $0x308] ss:$16 sps:$4 sm:$0xff]  }
 0x174   :  { %v388_v44 = vpop.f32.mrb[0].mxu0  ;;  %v4297_v1 = vpop.f32.mrb[0].mxu1 }
 0x175   :  { %v389_v45 = vadd.f32 %v388_v44, %v177_v42  ;;  %v390_v46 = vpop.f32.mrb[1].mxu0  ;;  %v431_v4 = vpop.f32.mrb[1].mxu1  ;;  %v3634_v42 = vld [vmem:[#allocation7 + $0x324] ss:$16 sps:$4 sm:$0xff]   ;;  %v3632_v44 = vld [vmem:[#allocation7 + $0x320] ss:$16 sps:$4 sm:$0xff]  }
 0x176   :  { %v391_v47 = vadd.f32 %v390_v46, %v181_v43  ;;  %v392_v48 = vpop.f32.mrb[2].mxu0  ;;  %v432_v5 = vadd.f32 %v431_v4, %v189_v61  ;;  %v433_v6 = vpop.f32.mrb[2].mxu1  ;;  %v3637_v43 = vld [vmem:[#allocation7 + $0x32c] ss:$16 sps:$4 sm:$0xff]   ;;  %v3640_v46 = vld [vmem:[#allocation7 + $0x344] ss:$16 sps:$4 sm:$0xff]  }
 0x177   :  { %vm436_vm0 = vcmp.gt.f32.partialorder %v389_v45, 0.0  ;;  %v440_v49 = vmul.f32 0.01, %v389_v45  ;;  %v393_v50 = vpop.f32.mrb[3].mxu0  ;;  %v434_v8 = vpop.f32.mrb[3].mxu1 }
 0x178   :  { %vm437_vm1 = vcmp.gt.f32.partialorder %v391_v47, 0.0  ;;  %v441_v51 = vmul.f32 0.01, %v391_v47  ;;  %vm439_vm2 = vcmp.gt.f32.partialorder %v432_v5, 0.0  ;;  %v443_v10 = vmul.f32 0.01, %v432_v5 }
 0x179   :  { %v444_v52 = vsel %vm436_vm0, %v389_v45, %v440_v49  ;;  %v3635_v45 = vld [vmem:[#allocation7 + $0x328] ss:$16 sps:$4 sm:$0xff]   ;;  %v3638_v48 = vld [vmem:[#allocation7 + $0x340] ss:$16 sps:$4 sm:$0xff]   ;;  %v3646_v50 = vld [vmem:[#allocation7 + $0x364] ss:$16 sps:$4 sm:$0xff]  }
 0x17a   :  { %v445_v54 = vsel %vm437_vm1, %v391_v47, %v441_v51  ;;  %v448_v58 = vpack.c.bf16 %v444_v52, %v444_v52  ;;  %v447_v13 = vsel %vm439_vm2, %v432_v5, %v443_v10  ;;  %v3643_v47 = vld [vmem:[#allocation7 + $0x34c] ss:$16 sps:$4 sm:$0xff]   ;;  %v3641_v49 = vld [vmem:[#allocation7 + $0x348] ss:$16 sps:$4 sm:$0xff]   ;;  %v3644_v52 = vld [vmem:[#allocation7 + $0x360] ss:$16 sps:$4 sm:$0xff]  }
 0x17b   :  { %v449_v55 = vpack.c.bf16 %v445_v54, %v445_v54  ;;  %v451_v14 = vpack.c.bf16 %v447_v13, %v447_v13  ;;  %v3649_v51 = vld [vmem:[#allocation7 + $0x36c] ss:$16 sps:$4 sm:$0xff]   ;;  %v3647_v54 = vld [vmem:[#allocation7 + $0x368] ss:$16 sps:$4 sm:$0xff]   ;;  %v3662_v6 = vld [vmem:[#allocation7 + $0x3c0] ss:$16 sps:$4 sm:$0xff]  }
 0x17c   :  { %v3661_v61 = vld [vmem:[#allocation7 + $0x3ac] ss:$16 sps:$4 sm:$0xff]   ;;  %v3670_v8 = vld [vmem:[#allocation7 + $0x3e4] ss:$16 sps:$4 sm:$0xff]  }
 0x17d   :  { %1274 = vmatprep.mubr.bf16.mxu0 %v449_v55  ;;  %1356 = vmatprep.mubr.bf16.mxu1 %v449_v55  ;;  %v3652_v55 = vld [vmem:[#allocation7 + $0x384] ss:$16 sps:$4 sm:$0xff]   ;;  %v3667_v4 = vld [vmem:[#allocation7 + $0x3cc] ss:$16 sps:$4 sm:$0xff]  }
 0x17e   :  { %1275 = vmatmul.mubr.bf16.vlgmr.msra.gmra.mrb[4].mxu0 %v448_v58  ;;  %1357 = vmatmul.mubr.bf16.vlgmr.msra.gmra.mrb[4].mxu1 %v448_v58  ;;  %v3650_v58 = vld [vmem:[#allocation7 + $0x380] ss:$16 sps:$4 sm:$0xff]   ;;  %v3701_v13 = vld [vmem:[#allocation8 + $0xc8] ss:$12 sps:$4 sm:$0xff]  }
 0x17f   :  { %1284 = vmatpush1.bf16.msra.mxu0 %v3578_v56  ;;  %1366 = vmatpush1.bf16.msra.mxu1 %v3581_v57  ;;  %v3655_v56 = vld [vmem:[#allocation7 + $0x38c] ss:$16 sps:$4 sm:$0xff]   ;;  %v4300_v57 = vsub.s32 2, %v4276_v38 }
 0x180   :  { %1285 = vmatprep.subr.bf16.mxu0 %v3586_v59  ;;  %1367 = vmatprep.subr.bf16.mxu1 %v3589_v60  ;;  %v3653_v59 = vld [vmem:[#allocation7 + $0x388] ss:$16 sps:$4 sm:$0xff]   ;;  %v3658_v60 = vld [vmem:[#allocation7 + $0x3a4] ss:$16 sps:$4 sm:$0xff]  }
 0x181   :  { %1315 = vmatprep.mubr.bf16.mxu0 %v451_v14  ;;  %1397 = vmatprep.mubr.bf16.mxu1 %v451_v14 }
 0x183   :  { %1286 = vmatpush1.bf16.msra.mxu0 %v3584_v62  ;;  %1368 = vmatpush1.bf16.msra.mxu1 %v3587_v63  ;;  %v185_v62 = vrot.slane %v4284_v40, %v4300_v57  ;;  %v3656_v63 = vld [vmem:[#allocation7 + $0x3a0] ss:$16 sps:$4 sm:$0xff]  }
 0x184   :  { %1287 = vmatprep.subr.bf16.mxu0 %v3592_v2  ;;  %1369 = vmatprep.subr.bf16.mxu1 %v3595_v3  ;;  %v3659_v2 = vld [vmem:[#allocation7 + $0x3a8] ss:$16 sps:$4 sm:$0xff]   ;;  %v3664_v3 = vld [vmem:[#allocation7 + $0x3c4] ss:$16 sps:$4 sm:$0xff]   ;;  %v3668_v40 = vld [vmem:[#allocation7 + $0x3e0] ss:$16 sps:$4 sm:$0xff]  }
 0x185   :  { %v430_v5 = vadd.f32 %v4297_v1, %v185_v62  ;;  %v3674_v1 = vld [vmem:[#allocation8] ss:$12 sps:$4 sm:$0xff]   ;;  %v3728_v62 = vld [vmem:[#allocation8 + $0x150] ss:$12 sps:$4 sm:$0xff]  }
 0x187   :  { %1288 = vmatpush1.bf16.msra.mxu0 %v3590_v7  ;;  %1370 = vmatpush1.bf16.msra.mxu1 %v3593_v9  ;;  %v3665_v7 = vld [vmem:[#allocation7 + $0x3c8] ss:$16 sps:$4 sm:$0xff]   ;;  %v3673_v9 = vld [vmem:[#allocation7 + $0x3ec] ss:$16 sps:$4 sm:$0xff]   ;;  %v442_v10 = vmul.f32 0.01, %v430_v5 }
 0x188   :  { %1289 = vmatprep.subr.bf16.mxu0 %v3598_v11  ;;  %1371 = vmatprep.subr.bf16.mxu1 %v3601_v12  ;;  %vm438_vm3 = vcmp.gt.f32.partialorder %v430_v5, 0.0  ;;  %v3671_v11 = vld [vmem:[#allocation7 + $0x3e8] ss:$16 sps:$4 sm:$0xff]   ;;  %v3676_v12 = vld [vmem:[#allocation8 + $0x4] ss:$12 sps:$4 sm:$0xff]  }
 0x189   :  { %v446_v14 = vsel %vm438_vm3, %v430_v5, %v442_v10  ;;  %v3737_v5 = vld [vmem:[#allocation8 + $0xb0] ss:$12 sps:$4 sm:$0xff]  }
 0x18b   :  { %1290 = vmatpush1.bf16.msra.mxu0 %v3596_v15  ;;  %1372 = vmatpush1.bf16.msra.mxu1 %v3599_v16  ;;  %v3702_v15 = vld [vmem:[#allocation8 + $0x8] ss:$12 sps:$4 sm:$0xff]   ;;  %v450_v16 = vpack.c.bf16 %v446_v14, %v446_v14 }
 0x18c   :  { %1291 = vmatprep.subr.bf16.mxu0 %v3604_v17  ;;  %1373 = vmatprep.subr.bf16.mxu1 %v3607_v18  ;;  %v3679_v17 = vld [vmem:[#allocation8 + $0x1c] ss:$12 sps:$4 sm:$0xff]   ;;  %v3706_v18 = vld [vmem:[#allocation8 + $0xe0] ss:$12 sps:$4 sm:$0xff]  }
 0x18f   :  { %1292 = vmatpush1.bf16.msra.mxu0 %v3602_v19  ;;  %1374 = vmatpush1.bf16.msra.mxu1 %v3605_v20  ;;  %v3677_v19 = vld [vmem:[#allocation8 + $0x18] ss:$12 sps:$4 sm:$0xff]   ;;  %v3707_v20 = vld [vmem:[#allocation8 + $0x20] ss:$12 sps:$4 sm:$0xff]  }
 0x190   :  { %1293 = vmatprep.subr.bf16.mxu0 %v3610_v21  ;;  %1375 = vmatprep.subr.bf16.mxu1 %v3613_v22  ;;  %v3682_v21 = vld [vmem:[#allocation8 + $0x34] ss:$12 sps:$4 sm:$0xff]   ;;  %v3711_v22 = vld [vmem:[#allocation8 + $0xf8] ss:$12 sps:$4 sm:$0xff]  }
 0x193   :  { %1294 = vmatpush1.bf16.msra.mxu0 %v3608_v23  ;;  %1376 = vmatpush1.bf16.msra.mxu1 %v3611_v24  ;;  %v3680_v23 = vld [vmem:[#allocation8 + $0x30] ss:$12 sps:$4 sm:$0xff]   ;;  %v3712_v24 = vld [vmem:[#allocation8 + $0x38] ss:$12 sps:$4 sm:$0xff]  }
 0x194   :  { %1295 = vmatprep.subr.bf16.mxu0 %v3616_v25  ;;  %1377 = vmatprep.subr.bf16.mxu1 %v3619_v26  ;;  %v3685_v25 = vld [vmem:[#allocation8 + $0x4c] ss:$12 sps:$4 sm:$0xff]   ;;  %v3716_v26 = vld [vmem:[#allocation8 + $0x110] ss:$12 sps:$4 sm:$0xff]  }
 0x197   :  { %1296 = vmatpush1.bf16.msra.mxu0 %v3614_v27  ;;  %1378 = vmatpush1.bf16.msra.mxu1 %v3617_v28  ;;  %v3683_v27 = vld [vmem:[#allocation8 + $0x48] ss:$12 sps:$4 sm:$0xff]   ;;  %v3717_v28 = vld [vmem:[#allocation8 + $0x50] ss:$12 sps:$4 sm:$0xff]  }
 0x198   :  { %1297 = vmatprep.subr.bf16.mxu0 %v3622_v29  ;;  %1379 = vmatprep.subr.bf16.mxu1 %v3625_v30  ;;  %v3688_v29 = vld [vmem:[#allocation8 + $0x64] ss:$12 sps:$4 sm:$0xff]   ;;  %v3721_v30 = vld [vmem:[#allocation8 + $0x128] ss:$12 sps:$4 sm:$0xff]  }
 0x19b   :  { %1298 = vmatpush1.bf16.msra.mxu0 %v3620_v31  ;;  %1380 = vmatpush1.bf16.msra.mxu1 %v3623_v32  ;;  %v3686_v31 = vld [vmem:[#allocation8 + $0x60] ss:$12 sps:$4 sm:$0xff]   ;;  %v3722_v32 = vld [vmem:[#allocation8 + $0x68] ss:$12 sps:$4 sm:$0xff]  }
 0x19c   :  { %1299 = vmatprep.subr.bf16.mxu0 %v3628_v33  ;;  %1381 = vmatprep.subr.bf16.mxu1 %v3631_v34  ;;  %v3691_v33 = vld [vmem:[#allocation8 + $0x7c] ss:$12 sps:$4 sm:$0xff]   ;;  %v3726_v34 = vld [vmem:[#allocation8 + $0x140] ss:$12 sps:$4 sm:$0xff]  }
 0x19f   :  { %1300 = vmatpush1.bf16.msra.mxu0 %v3626_v35  ;;  %1382 = vmatpush1.bf16.msra.mxu1 %v3629_v36  ;;  %v3689_v35 = vld [vmem:[#allocation8 + $0x78] ss:$12 sps:$4 sm:$0xff]   ;;  %v3727_v36 = vld [vmem:[#allocation8 + $0x80] ss:$12 sps:$4 sm:$0xff]  }
 0x1a0   :  { %1301 = vmatprep.subr.bf16.mxu0 %v3634_v42  ;;  %1383 = vmatprep.subr.bf16.mxu1 %v3637_v43  ;;  %v3694_v42 = vld [vmem:[#allocation8 + $0x94] ss:$12 sps:$4 sm:$0xff]   ;;  %v3692_v43 = vld [vmem:[#allocation8 + $0x90] ss:$12 sps:$4 sm:$0xff]  }
 0x1a3   :  { %1302 = vmatpush1.bf16.msra.mxu0 %v3632_v44  ;;  %1384 = vmatpush1.bf16.msra.mxu1 %v3635_v45  ;;  %v3697_v44 = vld [vmem:[#allocation8 + $0xac] ss:$12 sps:$4 sm:$0xff]   ;;  %v3695_v45 = vld [vmem:[#allocation8 + $0xa8] ss:$12 sps:$4 sm:$0xff]  }
 0x1a4   :  { %1303 = vmatprep.subr.bf16.mxu0 %v3640_v46  ;;  %1385 = vmatprep.subr.bf16.mxu1 %v3643_v47  ;;  %v3700_v46 = vld [vmem:[#allocation8 + $0xc4] ss:$12 sps:$4 sm:$0xff]   ;;  %v3698_v47 = vld [vmem:[#allocation8 + $0xc0] ss:$12 sps:$4 sm:$0xff]  }
 0x1a7   :  { %1304 = vmatpush1.bf16.msra.mxu0 %v3638_v48  ;;  %1386 = vmatpush1.bf16.msra.mxu1 %v3641_v49  ;;  %v3705_v48 = vld [vmem:[#allocation8 + $0xdc] ss:$12 sps:$4 sm:$0xff]   ;;  %v3703_v49 = vld [vmem:[#allocation8 + $0xd8] ss:$12 sps:$4 sm:$0xff]  }
 0x1a8   :  { %1305 = vmatprep.subr.bf16.mxu0 %v3646_v50  ;;  %1387 = vmatprep.subr.bf16.mxu1 %v3649_v51  ;;  %v3710_v50 = vld [vmem:[#allocation8 + $0xf4] ss:$12 sps:$4 sm:$0xff]   ;;  %v3708_v51 = vld [vmem:[#allocation8 + $0xf0] ss:$12 sps:$4 sm:$0xff]  }
 0x1ab   :  { %1306 = vmatpush1.bf16.msra.mxu0 %v3644_v52  ;;  %1388 = vmatpush1.bf16.msra.mxu1 %v3647_v54  ;;  %v3715_v52 = vld [vmem:[#allocation8 + $0x10c] ss:$12 sps:$4 sm:$0xff]   ;;  %v3713_v54 = vld [vmem:[#allocation8 + $0x108] ss:$12 sps:$4 sm:$0xff]  }
 0x1ac   :  { %1307 = vmatprep.subr.bf16.mxu0 %v3652_v55  ;;  %1389 = vmatprep.subr.bf16.mxu1 %v3655_v56  ;;  %v3720_v55 = vld [vmem:[#allocation8 + $0x124] ss:$12 sps:$4 sm:$0xff]   ;;  %v3718_v56 = vld [vmem:[#allocation8 + $0x120] ss:$12 sps:$4 sm:$0xff]  }
 0x1af   :  { %1308 = vmatpush1.bf16.msra.mxu0 %v3650_v58  ;;  %1390 = vmatpush1.bf16.msra.mxu1 %v3653_v59  ;;  %v3725_v58 = vld [vmem:[#allocation8 + $0x13c] ss:$12 sps:$4 sm:$0xff]   ;;  %v3723_v59 = vld [vmem:[#allocation8 + $0x138] ss:$12 sps:$4 sm:$0xff]  }
 0x1b0   :  { %1309 = vmatprep.subr.bf16.mxu0 %v3658_v60  ;;  %1391 = vmatprep.subr.bf16.mxu1 %v3661_v61  ;;  %v3730_v60 = vld [vmem:[#allocation8 + $0x154] ss:$12 sps:$4 sm:$0xff]   ;;  %v3731_v61 = vld [vmem:[#allocation8 + $0x158] ss:$12 sps:$4 sm:$0xff]  }
 0x1b3   :  { %1310 = vmatpush1.bf16.msra.mxu0 %v3656_v63  ;;  %1392 = vmatpush1.bf16.msra.mxu1 %v3659_v2  ;;  %v3732_v63 = vld [vmem:[#allocation8 + $0x98] ss:$12 sps:$4 sm:$0xff]  }
 0x1b4   :  { %1311 = vmatprep.subr.bf16.mxu0 %v3664_v3  ;;  %1393 = vmatprep.subr.bf16.mxu1 %v3667_v4  ;;  %v3735_v2 = vld [vmem:[#allocation8 + $0x16c] ss:$12 sps:$4 sm:$0xff]   ;;  %v3736_v3 = vld [vmem:[#allocation8 + $0x170] ss:$12 sps:$4 sm:$0xff]   ;;  %v3733_v4 = vld [vmem:[#allocation8 + $0x168] ss:$12 sps:$4 sm:$0xff]  }
 0x1b7   :  { %1312 = vmatpush1.bf16.msra.mxu0 %v3662_v6  ;;  %1394 = vmatpush1.bf16.msra.mxu1 %v3665_v7  ;;  %v3740_v6 = vld [vmem:[#allocation8 + $0x184] ss:$12 sps:$4 sm:$0xff]   ;;  %v3741_v7 = vld [vmem:[#allocation8 + $0x248] ss:$12 sps:$4 sm:$0xff]  }
 0x1b8   :  { %1313 = vmatprep.subr.bf16.mxu0 %v3670_v8  ;;  %1395 = vmatprep.subr.bf16.mxu1 %v3673_v9  ;;  %v4308_v8 = vld [vmem:[%s4357_s4] sm:$0xf] }
 0x1b9   :  { %v585_v9 = vrot.slane %v4308_v8, %v4279_v39  ;;  %v589_v10 = vrot.slane %v4308_v8, %v4287_v41 }
 0x1bb   :  { %1314 = vmatpush1.bf16.msra.mxu0 %v3668_v40  ;;  %1396 = vmatpush1.bf16.msra.mxu1 %v3671_v11  ;;  %v597_v40 = vrot.slane %v4308_v8, %v188_v53 }
 0x1bc   :  { %2079 = vmatprep.subr.bf16.mxu0 %v3676_v12  ;;  %3296 = vmatprep.subr.bf16.mxu1 %v3701_v13 }
 0x1be   :  { %1316 = vmatmul.mubr.bf16.vlgmr.msra.gmra.mrb[4].mxu0 %v450_v16  ;;  %1398 = vmatmul.mubr.bf16.vlgmr.msra.gmra.mrb[4].mxu1 %v450_v16 }
 0x1bf   :  { %2080 = vmatpush1.bf16.msra.mxu0 %v3674_v1  ;;  %3297 = vmatpush3.bf16.msra.mxu1 %v3702_v15 }
 0x1c0   :  { %2081 = vmatprep.subr.bf16.mxu0 %v3679_v17  ;;  %3298 = vmatprep.subr.bf16.mxu1 %v3706_v18 }
 0x1c3   :  { %2082 = vmatpush1.bf16.msra.mxu0 %v3677_v19  ;;  %3299 = vmatpush3.bf16.msra.mxu1 %v3707_v20 }
 0x1c4   :  { %2083 = vmatprep.subr.bf16.mxu0 %v3682_v21  ;;  %3300 = vmatprep.subr.bf16.mxu1 %v3711_v22 }
 0x1c7   :  { %2084 = vmatpush1.bf16.msra.mxu0 %v3680_v23  ;;  %3301 = vmatpush3.bf16.msra.mxu1 %v3712_v24 }
 0x1c8   :  { %2085 = vmatprep.subr.bf16.mxu0 %v3685_v25  ;;  %3302 = vmatprep.subr.bf16.mxu1 %v3716_v26  ;;  %v3738_v25 = vld [vmem:[#allocation8 + $0x180] ss:$12 sps:$4 sm:$0xff]   ;;  %v3742_v26 = vld [vmem:[#allocation8 + $0x188] ss:$12 sps:$4 sm:$0xff]  }
 0x1cb   :  { %2086 = vmatpush1.bf16.msra.mxu0 %v3683_v27  ;;  %3303 = vmatpush3.bf16.msra.mxu1 %v3717_v28 }
 0x1cc   :  { %2087 = vmatprep.subr.bf16.mxu0 %v3688_v29  ;;  %3304 = vmatprep.subr.bf16.mxu1 %v3721_v30  ;;  %v3745_v29 = vld [vmem:[#allocation8 + $0x19c] ss:$12 sps:$4 sm:$0xff]   ;;  %v3746_v30 = vld [vmem:[#allocation8 + $0x260] ss:$12 sps:$4 sm:$0xff]  }
 0x1cf   :  { %2088 = vmatpush1.bf16.msra.mxu0 %v3686_v31  ;;  %3305 = vmatpush3.bf16.msra.mxu1 %v3722_v32  ;;  %v3743_v32 = vld [vmem:[#allocation8 + $0x198] ss:$12 sps:$4 sm:$0xff]  }
 0x1d0   :  { %2089 = vmatprep.subr.bf16.mxu0 %v3691_v33  ;;  %3306 = vmatprep.subr.bf16.mxu1 %v3726_v34  ;;  %v3747_v33 = vld [vmem:[#allocation8 + $0x1a0] ss:$12 sps:$4 sm:$0xff]  }
 0x1d1   :  { %v3750_v34 = vld [vmem:[#allocation8 + $0x1b4] ss:$12 sps:$4 sm:$0xff]  }
 0x1d3   :  { %2090 = vmatpush1.bf16.msra.mxu0 %v3689_v35  ;;  %3307 = vmatpush3.bf16.msra.mxu1 %v3727_v36  ;;  %v3751_v35 = vld [vmem:[#allocation8 + $0x278] ss:$12 sps:$4 sm:$0xff]   ;;  %v3748_v36 = vld [vmem:[#allocation8 + $0x1b0] ss:$12 sps:$4 sm:$0xff]  }
 0x1d4   :  { %2091 = vmatprep.subr.bf16.mxu0 %v3694_v42  ;;  %3308 = vmatprep.subr.bf16.mxu1 %v3731_v61  ;;  %v3752_v42 = vld [vmem:[#allocation8 + $0x1b8] ss:$12 sps:$4 sm:$0xff]   ;;  %v3768_v61 = vld [vmem:[#allocation8 + $0x210] ss:$12 sps:$4 sm:$0xff]  }
 0x1d7   :  { %2092 = vmatpush1.bf16.msra.mxu0 %v3692_v43  ;;  %3309 = vmatpush3.bf16.msra.mxu1 %v3732_v63  ;;  %v3755_v43 = vld [vmem:[#allocation8 + $0x1cc] ss:$12 sps:$4 sm:$0xff]  }
 0x1d8   :  { %2093 = vmatprep.subr.bf16.mxu0 %v3697_v44  ;;  %3310 = vmatprep.subr.bf16.mxu1 %v3736_v3  ;;  %v3756_v44 = vld [vmem:[#allocation8 + $0x290] ss:$12 sps:$4 sm:$0xff]   ;;  %v3775_v63 = vld [vmem:[#allocation8 + $0x22c] ss:$12 sps:$4 sm:$0xff]  }
 0x1db   :  { %2094 = vmatpush1.bf16.msra.mxu0 %v3695_v45  ;;  %3311 = vmatpush3.bf16.msra.mxu1 %v3737_v5  ;;  %v3753_v45 = vld [vmem:[#allocation8 + $0x1c8] ss:$12 sps:$4 sm:$0xff]   ;;  %v3777_v5 = vld [vmem:[#allocation8 + $0x230] ss:$12 sps:$4 sm:$0xff]  }
 0x1dc   :  { %2095 = vmatprep.subr.bf16.mxu0 %v3700_v46  ;;  %3318 = vmatprep.subr.bf16.mxu1 %v3741_v7  ;;  %v3757_v46 = vld [vmem:[#allocation8 + $0x1d0] ss:$12 sps:$4 sm:$0xff]  }
 0x1df   :  { %2096 = vmatpush1.bf16.msra.mxu0 %v3698_v47  ;;  %v3760_v47 = vld [vmem:[#allocation8 + $0x1e4] ss:$12 sps:$4 sm:$0xff]  }
 0x1e0   :  { %2097 = vmatprep.subr.bf16.mxu0 %v3705_v48  ;;  %v3761_v48 = vld [vmem:[#allocation8 + $0x2a8] ss:$12 sps:$4 sm:$0xff]  }
 0x1e3   :  { %2098 = vmatpush1.bf16.msra.mxu0 %v3703_v49  ;;  %v3758_v49 = vld [vmem:[#allocation8 + $0x1e0] ss:$12 sps:$4 sm:$0xff]  }
 0x1e4   :  { %2099 = vmatprep.subr.bf16.mxu0 %v3710_v50  ;;  %v3762_v50 = vld [vmem:[#allocation8 + $0x1e8] ss:$12 sps:$4 sm:$0xff]  }
 0x1e7   :  { %2100 = vmatpush1.bf16.msra.mxu0 %v3708_v51  ;;  %v3765_v51 = vld [vmem:[#allocation8 + $0x1fc] ss:$12 sps:$4 sm:$0xff]  }
 0x1e8   :  { %2101 = vmatprep.subr.bf16.mxu0 %v3715_v52  ;;  %v3766_v52 = vld [vmem:[#allocation8 + $0x2c0] ss:$12 sps:$4 sm:$0xff]  }
 0x1eb   :  { %2102 = vmatpush1.bf16.msra.mxu0 %v3713_v54  ;;  %v593_v54 = vrot.slane %v4308_v8, %v4300_v57  ;;  %v3778_v8 = vld [vmem:[#allocation8 + $0x240] ss:$12 sps:$4 sm:$0xff]  }
 0x1ec   :  { %2103 = vmatprep.subr.bf16.mxu0 %v3720_v55  ;;  %v3763_v55 = vld [vmem:[#allocation8 + $0x1f8] ss:$12 sps:$4 sm:$0xff]  }
 0x1ef   :  { %2104 = vmatpush1.bf16.msra.mxu0 %v3718_v56  ;;  %v3767_v56 = vld [vmem:[#allocation8 + $0x200] ss:$12 sps:$4 sm:$0xff]  }
 0x1f0   :  { %2105 = vmatprep.subr.bf16.mxu0 %v3725_v58  ;;  %v3770_v58 = vld [vmem:[#allocation8 + $0x214] ss:$12 sps:$4 sm:$0xff]  }
 0x1f3   :  { %2106 = vmatpush1.bf16.msra.mxu0 %v3723_v59  ;;  %v3771_v59 = vld [vmem:[#allocation8 + $0x2d8] ss:$12 sps:$4 sm:$0xff]  }
 0x1f4   :  { %2107 = vmatprep.subr.bf16.mxu0 %v3730_v60 }
 0x1f7   :  { %2108 = vmatpush1.bf16.msra.mxu0 %v3728_v62  ;;  %v3772_v62 = vld [vmem:[#allocation8 + $0x218] ss:$12 sps:$4 sm:$0xff]  }
 0x1f8   :  { %2109 = vmatprep.subr.bf16.mxu0 %v3735_v2  ;;  %v3776_v2 = vld [vmem:[#allocation8 + $0x2f0] ss:$12 sps:$4 sm:$0xff]  }
 0x1fb   :  { %2110 = vmatpush1.bf16.msra.mxu0 %v3733_v4  ;;  %v3773_v4 = vld [vmem:[#allocation8 + $0x228] ss:$12 sps:$4 sm:$0xff]  }
 0x1fc   :  { %2120 = vmatprep.subr.bf16.mxu0 %v3740_v6  ;;  %v3780_v6 = vld [vmem:[#allocation8 + $0x244] ss:$12 sps:$4 sm:$0xff]  }
 0x291   :  { %v1317_v11 = vpop.f32.mrb[4].mxu0  ;;  %v4317_v12 = vpop.f32.mrb[4].mxu1 }
 0x292   :  { %v3391_v13 = vadd.f32 %v1317_v11, %v585_v9  ;;  %v1319_v14 = vpop.f32.mrb[5].mxu0  ;;  %v1401_v1 = vpop.f32.mrb[5].mxu1  ;;  %v3393_v60 = vadd.f32 %v4317_v12, %v593_v54  ;;  %v3786_v11 = vld [vmem:[#allocation8 + $0x274] ss:$12 sps:$4 sm:$0xff]   ;;  %v3784_v12 = vld [vmem:[#allocation8 + $0x270] ss:$12 sps:$4 sm:$0xff]  }
 0x293   :  { %v3392_v15 = vadd.f32 %v1319_v14, %v589_v10  ;;  %v3394_v16 = vadd.f32 %v1401_v1, %v597_v40  ;;  %v1321_v17 = vpop.f32.mrb[6].mxu0  ;;  %v1403_v18 = vpop.f32.mrb[6].mxu1  ;;  %v3783_v10 = vld [vmem:[#allocation8 + $0x25c] ss:$12 sps:$4 sm:$0xff]   ;;  %v3781_v40 = vld [vmem:[#allocation8 + $0x258] ss:$12 sps:$4 sm:$0xff]  }
 0x294   :  { %vm1406_vm4 = vcmp.gt.f32.partialorder %v3391_v13, 0.0  ;;  %v1410_v19 = vmul.f32 0.01, %v3391_v13  ;;  %v1322_v38 = vpop.f32.mrb[7].mxu0  ;;  %v1404_v23 = vpop.f32.mrb[7].mxu1  ;;  %vm1408_vm7 = vcmp.gt.f32.partialorder %v3393_v60, 0.0 }
 0x295   :  { %vm1407_vm5 = vcmp.gt.f32.partialorder %v3392_v15, 0.0  ;;  %v1411_v20 = vmul.f32 0.01, %v3392_v15  ;;  %vm1409_vm6 = vcmp.gt.f32.partialorder %v3394_v16, 0.0  ;;  %v1413_v21 = vmul.f32 0.01, %v3394_v16 }
 0x296   :  { %v1414_v22 = vsel %vm1406_vm4, %v3391_v13, %v1410_v19  ;;  %v1412_v3 = vmul.f32 0.01, %v3393_v60  ;;  %v3789_v13 = vld [vmem:[#allocation8 + $0x28c] ss:$12 sps:$4 sm:$0xff]   ;;  %v3787_v14 = vld [vmem:[#allocation8 + $0x288] ss:$12 sps:$4 sm:$0xff]  }
 0x297   :  { %v1415_v53 = vsel %vm1407_vm5, %v3392_v15, %v1411_v20  ;;  %v1417_v27 = vsel %vm1409_vm6, %v3394_v16, %v1413_v21  ;;  %v1418_v28 = vpack.c.bf16 %v1414_v22, %v1414_v22  ;;  %v3792_v1 = vld [vmem:[#allocation8 + $0x2a4] ss:$12 sps:$4 sm:$0xff]   ;;  %v3790_v15 = vld [vmem:[#allocation8 + $0x2a0] ss:$12 sps:$4 sm:$0xff]   ;;  %v3795_v16 = vld [vmem:[#allocation8 + $0x2bc] ss:$12 sps:$4 sm:$0xff]  }
 0x298   :  { %v1419_v24 = vpack.c.bf16 %v1415_v53, %v1415_v53  ;;  %v1421_v31 = vpack.c.bf16 %v1417_v27, %v1417_v27  ;;  %v1416_v7 = vsel %vm1408_vm7, %v3393_v60, %v1412_v3  ;;  %v3793_v17 = vld [vmem:[#allocation8 + $0x2b8] ss:$12 sps:$4 sm:$0xff]   ;;  %v3798_v18 = vld [vmem:[#allocation8 + $0x2d4] ss:$12 sps:$4 sm:$0xff]   ;;  %v3796_v19 = vld [vmem:[#allocation8 + $0x2d0] ss:$12 sps:$4 sm:$0xff]  }
 0x299   :  { %v1420_v9 = vpack.c.bf16 %v1416_v7, %v1416_v7  ;;  %v3801_v20 = vld [vmem:[#allocation8 + $0x2ec] ss:$12 sps:$4 sm:$0xff]   ;;  %v3799_v21 = vld [vmem:[#allocation8 + $0x2e8] ss:$12 sps:$4 sm:$0xff]   ;;  %v3874_v60 = vld [vmem:[#allocation11 + $0x40] sm:$0xff]  }
 0x29a   :  { %2111 = vmatprep.mubr.bf16.mxu0 %v1419_v24  ;;  %2193 = vmatprep.mubr.bf16.mxu1 %v1419_v24  ;;  %v3802_v22 = vld [vmem:[#allocation10] ss:$8 sps:$4 sm:$0xff]   ;;  %v3804_v38 = vld [vmem:[#allocation10 + $0x4] ss:$8 sps:$4 sm:$0xff]   ;;  %v3807_v23 = vld [vmem:[#allocation10 + $0x14] ss:$8 sps:$4 sm:$0xff]  }
 0x29b   :  { %2112 = vmatmul.mubr.bf16.vlgmr.msra.gmra.mrb[8].mxu0 %v1418_v28  ;;  %2194 = vmatmul.mubr.bf16.vlgmr.msra.gmra.mrb[8].mxu1 %v1418_v28  ;;  %v3805_v53 = vld [vmem:[#allocation10 + $0x10] ss:$8 sps:$4 sm:$0xff]   ;;  %v3810_v24 = vld [vmem:[#allocation10 + $0x24] ss:$8 sps:$4 sm:$0xff]  }
 0x29c   :  { %2121 = vmatpush1.bf16.msra.mxu0 %v3738_v25  ;;  %3319 = vmatpush3.bf16.msra.mxu1 %v3742_v26  ;;  %v3808_v25 = vld [vmem:[#allocation10 + $0x20] ss:$8 sps:$4 sm:$0xff]   ;;  %v3813_v26 = vld [vmem:[#allocation10 + $0x34] ss:$8 sps:$4 sm:$0xff]   ;;  %v3811_v27 = vld [vmem:[#allocation10 + $0x30] ss:$8 sps:$4 sm:$0xff]  }
 0x29d   :  { %2152 = vmatprep.mubr.bf16.mxu0 %v1421_v31  ;;  %2233 = vmatprep.mubr.bf16.mxu1 %v1421_v31  ;;  %v3816_v28 = vld [vmem:[#allocation10 + $0x44] ss:$8 sps:$4 sm:$0xff]   ;;  %v3817_v31 = vld [vmem:[#allocation10 + $0x50] ss:$8 sps:$4 sm:$0xff]  }
 0x29e   :  { %2122 = vmatprep.subr.bf16.mxu0 %v3745_v29  ;;  %3320 = vmatprep.subr.bf16.mxu1 %v3746_v30  ;;  %v3814_v29 = vld [vmem:[#allocation10 + $0x40] ss:$8 sps:$4 sm:$0xff]   ;;  %v3819_v30 = vld [vmem:[#allocation10 + $0x54] ss:$8 sps:$4 sm:$0xff]   ;;  %v3846_v54 = vld [vmem:[#allocation10 + $0xe4] ss:$8 sps:$4 sm:$0xff]  }
 0x29f   :  { %v3879_v3 = vld [vmem:[#allocation11 + $0x10] sm:$0xff]   ;;  %v3883_v7 = vld [vmem:[#allocation11 + $0x20] sm:$0xff]  }
 0x2a0   :  { %2123 = vmatpush1.bf16.msra.mxu0 %v3743_v32  ;;  %3321 = vmatpush3.bf16.msra.mxu1 %v3747_v33  ;;  %v3822_v32 = vld [vmem:[#allocation10 + $0x64] ss:$8 sps:$4 sm:$0xff]   ;;  %v3820_v33 = vld [vmem:[#allocation10 + $0x60] ss:$8 sps:$4 sm:$0xff]  }
 0x2a1   :  { %2124 = vmatprep.subr.bf16.mxu0 %v3750_v34  ;;  %3322 = vmatprep.subr.bf16.mxu1 %v3751_v35  ;;  %v3825_v34 = vld [vmem:[#allocation10 + $0x74] ss:$8 sps:$4 sm:$0xff]   ;;  %v3823_v35 = vld [vmem:[#allocation10 + $0x70] ss:$8 sps:$4 sm:$0xff]  }
 0x2a4   :  { %2125 = vmatpush1.bf16.msra.mxu0 %v3748_v36  ;;  %3323 = vmatpush3.bf16.msra.mxu1 %v3752_v42  ;;  %v3828_v36 = vld [vmem:[#allocation10 + $0x84] ss:$8 sps:$4 sm:$0xff]   ;;  %v3826_v42 = vld [vmem:[#allocation10 + $0x80] ss:$8 sps:$4 sm:$0xff]  }
 0x2a5   :  { %2126 = vmatprep.subr.bf16.mxu0 %v3755_v43  ;;  %3324 = vmatprep.subr.bf16.mxu1 %v3756_v44  ;;  %v3831_v43 = vld [vmem:[#allocation10 + $0x94] ss:$8 sps:$4 sm:$0xff]   ;;  %v3829_v44 = vld [vmem:[#allocation10 + $0x90] ss:$8 sps:$4 sm:$0xff]  }
 0x2a8   :  { %2127 = vmatpush1.bf16.msra.mxu0 %v3753_v45  ;;  %3325 = vmatpush3.bf16.msra.mxu1 %v3757_v46  ;;  %v3834_v45 = vld [vmem:[#allocation10 + $0xa4] ss:$8 sps:$4 sm:$0xff]   ;;  %v3832_v46 = vld [vmem:[#allocation10 + $0xa0] ss:$8 sps:$4 sm:$0xff]  }
 0x2a9   :  { %2128 = vmatprep.subr.bf16.mxu0 %v3760_v47  ;;  %3326 = vmatprep.subr.bf16.mxu1 %v3761_v48  ;;  %v3837_v47 = vld [vmem:[#allocation10 + $0xb4] ss:$8 sps:$4 sm:$0xff]   ;;  %v3835_v48 = vld [vmem:[#allocation10 + $0xb0] ss:$8 sps:$4 sm:$0xff]  }
 0x2ac   :  { %2129 = vmatpush1.bf16.msra.mxu0 %v3758_v49  ;;  %3327 = vmatpush3.bf16.msra.mxu1 %v3762_v50  ;;  %v3840_v49 = vld [vmem:[#allocation10 + $0xc4] ss:$8 sps:$4 sm:$0xff]   ;;  %v3838_v50 = vld [vmem:[#allocation10 + $0xc0] ss:$8 sps:$4 sm:$0xff]  }
 0x2ad   :  { %2130 = vmatprep.subr.bf16.mxu0 %v3765_v51  ;;  %3328 = vmatprep.subr.bf16.mxu1 %v3766_v52  ;;  %v3843_v51 = vld [vmem:[#allocation10 + $0xd4] ss:$8 sps:$4 sm:$0xff]   ;;  %v3841_v52 = vld [vmem:[#allocation10 + $0xd0] ss:$8 sps:$4 sm:$0xff]  }
 0x2b0   :  { %2131 = vmatpush1.bf16.msra.mxu0 %v3763_v55  ;;  %3329 = vmatpush3.bf16.msra.mxu1 %v3767_v56  ;;  %v3844_v55 = vld [vmem:[#allocation10 + $0xe0] ss:$8 sps:$4 sm:$0xff]   ;;  %v3849_v56 = vld [vmem:[#allocation10 + $0xf4] ss:$8 sps:$4 sm:$0xff]  }
 0x2b1   :  { %2132 = vmatprep.subr.bf16.mxu0 %v3770_v58  ;;  %3330 = vmatprep.subr.bf16.mxu1 %v3771_v59  ;;  %v3847_v58 = vld [vmem:[#allocation10 + $0xf0] ss:$8 sps:$4 sm:$0xff]   ;;  %v3852_v59 = vld [vmem:[#allocation10 + $0x104] ss:$8 sps:$4 sm:$0xff]  }
 0x2b4   :  { %2133 = vmatpush1.bf16.msra.mxu0 %v3768_v61  ;;  %3331 = vmatpush3.bf16.msra.mxu1 %v3772_v62  ;;  %v3875_v61 = vld [vmem:[#allocation11] sm:$0xff]   ;;  %v3876_v62 = vld [vmem:[#allocation11 + $0x48] sm:$0xff]  }
 0x2b5   :  { %2134 = vmatprep.subr.bf16.mxu0 %v3775_v63  ;;  %3332 = vmatprep.subr.bf16.mxu1 %v3776_v2  ;;  %v3877_v63 = vld [vmem:[#allocation11 + $0x8] sm:$0xff]   ;;  %v3878_v2 = vld [vmem:[#allocation11 + $0x50] sm:$0xff]  }
 0x2b8   :  { %2135 = vmatpush1.bf16.msra.mxu0 %v3773_v4  ;;  %3333 = vmatpush3.bf16.msra.mxu1 %v3777_v5  ;;  %v3880_v4 = vld [vmem:[#allocation11 + $0x58] sm:$0xff]  }
 0x2b9   :  { %2136 = vmatprep.subr.bf16.mxu0 %v3780_v6  ;;  %2553 = vmatprep.subr.bf16.mxu1 %v3804_v38  ;;  %v3881_v5 = vld [vmem:[#allocation11 + $0x18] sm:$0xff]   ;;  %v3882_v6 = vld [vmem:[#allocation11 + $0x60] sm:$0xff]  }
 0x2bb   :  { %2234 = vmatmul.mubr.bf16.vlgmr.msra.gmra.mrb[12].mxu1 %v1420_v9 }
 0x2bc   :  { %2137 = vmatpush1.bf16.msra.mxu0 %v3778_v8  ;;  %2554 = vmatpush1.bf16.msra.mxu1 %v3802_v22  ;;  %v3884_v8 = vld [vmem:[#allocation11 + $0x68] sm:$0xff]  }
 0x2bd   :  { %2138 = vmatprep.subr.bf16.mxu0 %v3783_v10  ;;  %2555 = vmatprep.subr.bf16.mxu1 %v3807_v23 }
 0x2c0   :  { %2139 = vmatpush1.bf16.msra.mxu0 %v3781_v40  ;;  %2556 = vmatpush1.bf16.msra.mxu1 %v3805_v53 }
 0x2c1   :  { %2140 = vmatprep.subr.bf16.mxu0 %v3786_v11  ;;  %2557 = vmatprep.subr.bf16.mxu1 %v3810_v24 }
 0x2c4   :  { %2141 = vmatpush1.bf16.msra.mxu0 %v3784_v12  ;;  %2558 = vmatpush1.bf16.msra.mxu1 %v3808_v25 }
 0x2c5   :  { %2142 = vmatprep.subr.bf16.mxu0 %v3789_v13  ;;  %2559 = vmatprep.subr.bf16.mxu1 %v3813_v26 }
 0x2c8   :  { %2143 = vmatpush1.bf16.msra.mxu0 %v3787_v14  ;;  %2560 = vmatpush1.bf16.msra.mxu1 %v3811_v27  ;;  %v1550_v14 = vld [vmem:[%s4359_s6] sm:$0x7] }
 0x2c9   :  { %2144 = vmatprep.subr.bf16.mxu0 %v3792_v1  ;;  %2561 = vmatprep.subr.bf16.mxu1 %v3816_v28  ;;  %v1563_v1 = vrot.slane %v1550_v14, %v4300_v57  ;;  %v1555_v22 = vrot.slane %v1550_v14, %v4279_v39  ;;  %v1559_v38 = vrot.slane %v1550_v14, %v4287_v41 }
 0x2cc   :  { %2145 = vmatpush1.bf16.msra.mxu0 %v3790_v15  ;;  %2562 = vmatpush1.bf16.msra.mxu1 %v3814_v29 }
 0x2cd   :  { %2146 = vmatprep.subr.bf16.mxu0 %v3795_v16  ;;  %2563 = vmatprep.subr.bf16.mxu1 %v3819_v30 }
 0x2d0   :  { %2147 = vmatpush1.bf16.msra.mxu0 %v3793_v17  ;;  %2564 = vmatpush1.bf16.msra.mxu1 %v3817_v31 }
 0x2d1   :  { %2148 = vmatprep.subr.bf16.mxu0 %v3798_v18  ;;  %2565 = vmatprep.subr.bf16.mxu1 %v3822_v32  ;;  %v3850_v32 = vld [vmem:[#allocation10 + $0x100] ss:$8 sps:$4 sm:$0xff]  }
 0x2d4   :  { %2149 = vmatpush1.bf16.msra.mxu0 %v3796_v19  ;;  %2566 = vmatpush1.bf16.msra.mxu1 %v3820_v33 }
 0x2d5   :  { %2150 = vmatprep.subr.bf16.mxu0 %v3801_v20  ;;  %2567 = vmatprep.subr.bf16.mxu1 %v3825_v34  ;;  %v3855_v34 = vld [vmem:[#allocation10 + $0x114] ss:$8 sps:$4 sm:$0xff]  }
 0x2d8   :  { %2151 = vmatpush1.bf16.msra.mxu0 %v3799_v21  ;;  %2568 = vmatpush1.bf16.msra.mxu1 %v3823_v35  ;;  %v3853_v35 = vld [vmem:[#allocation10 + $0x110] ss:$8 sps:$4 sm:$0xff]  }
 0x2d9   :  { %2569 = vmatprep.subr.bf16.mxu1 %v3828_v36  ;;  %3340 = vmatprep.subr.bf16.mxu0 %v3874_v60  ;;  %v3858_v36 = vld [vmem:[#allocation10 + $0x124] ss:$8 sps:$4 sm:$0xff]   ;;  %v3889_v60 = vld [vmem:[#allocation11 + $0x38] sm:$0xff]  }
 0x2db   :  { %2153 = vmatmul.mubr.bf16.vlgmr.msra.gmra.mrb[8].mxu0 %v1420_v9  ;;  %v3885_v9 = vld [vmem:[#allocation11 + $0x28] sm:$0xff]  }
 0x2dc   :  { %2570 = vmatpush1.bf16.msra.mxu1 %v3826_v42  ;;  %3341 = vmatpush3.bf16.msra.mxu0 %v3875_v61  ;;  %v3856_v42 = vld [vmem:[#allocation10 + $0x120] ss:$8 sps:$4 sm:$0xff]   ;;  %v4104_v61 = vmov 0.0  }
 0x2dd   :  { %2571 = vmatprep.subr.bf16.mxu1 %v3831_v43  ;;  %3342 = vmatprep.subr.bf16.mxu0 %v3876_v62  ;;  %v3861_v43 = vld [vmem:[#allocation10 + $0x134] ss:$8 sps:$4 sm:$0xff]  }
 0x2de   :  { %v2301_v62 = vld [vmem:[%s4361_s8] sm:$0x3] }
 0x2e0   :  { %2572 = vmatpush1.bf16.msra.mxu1 %v3829_v44  ;;  %3343 = vmatpush3.bf16.msra.mxu0 %v3877_v63  ;;  %v3859_v44 = vld [vmem:[#allocation10 + $0x130] ss:$8 sps:$4 sm:$0xff]   ;;  %v2306_v63 = vrot.slane %v2301_v62, %v4279_v39  ;;  %v3891_v39 = vld [vmem:[#allocation13 + $0x8] sm:$0xff]  }
 0x2e1   :  { %2573 = vmatprep.subr.bf16.mxu1 %v3834_v45  ;;  %3344 = vmatprep.subr.bf16.mxu0 %v3878_v2  ;;  %v3864_v45 = vld [vmem:[#allocation10 + $0x144] ss:$8 sps:$4 sm:$0xff]   ;;  %v2310_v2 = vrot.slane %v2301_v62, %v4287_v41  ;;  %v3892_v41 = vld [vmem:[#allocation13 + $0x10] sm:$0xff]  }
 0x2e4   :  { %2574 = vmatpush1.bf16.msra.mxu1 %v3832_v46  ;;  %3345 = vmatpush3.bf16.msra.mxu0 %v3879_v3  ;;  %v3862_v46 = vld [vmem:[#allocation10 + $0x140] ss:$8 sps:$4 sm:$0xff]  }
 0x2e5   :  { %2575 = vmatprep.subr.bf16.mxu1 %v3837_v47  ;;  %3346 = vmatprep.subr.bf16.mxu0 %v3880_v4  ;;  %v3867_v47 = vld [vmem:[#allocation10 + $0x154] ss:$8 sps:$4 sm:$0xff]  }
 0x2e8   :  { %2576 = vmatpush1.bf16.msra.mxu1 %v3835_v48  ;;  %3347 = vmatpush3.bf16.msra.mxu0 %v3881_v5  ;;  %v3865_v48 = vld [vmem:[#allocation10 + $0x150] ss:$8 sps:$4 sm:$0xff]  }
 0x2e9   :  { %2577 = vmatprep.subr.bf16.mxu1 %v3840_v49  ;;  %3348 = vmatprep.subr.bf16.mxu0 %v3882_v6  ;;  %v3870_v49 = vld [vmem:[#allocation10 + $0x164] ss:$8 sps:$4 sm:$0xff]  }
 0x2ec   :  { %2578 = vmatpush1.bf16.msra.mxu1 %v3838_v50  ;;  %3349 = vmatpush3.bf16.msra.mxu0 %v3883_v7  ;;  %v3873_v50 = vld [vmem:[#allocation10 + $0x174] ss:$8 sps:$4 sm:$0xff]  }
 0x2ed   :  { %2579 = vmatprep.subr.bf16.mxu1 %v3843_v51  ;;  %3350 = vmatprep.subr.bf16.mxu0 %v3884_v8 }
 0x2f0   :  { %2580 = vmatpush1.bf16.msra.mxu1 %v3841_v52  ;;  %3351 = vmatpush3.bf16.msra.mxu0 %v3885_v9  ;;  %v3871_v52 = vld [vmem:[#allocation10 + $0x170] ss:$8 sps:$4 sm:$0xff]  }
 0x2f1   :  { %2581 = vmatprep.subr.bf16.mxu1 %v3846_v54 }
 0x2f4   :  { %2582 = vmatpush1.bf16.msra.mxu1 %v3844_v55 }
 0x2f5   :  { %2583 = vmatprep.subr.bf16.mxu1 %v3849_v56  ;;  %v3886_v56 = vld [vmem:[#allocation11 + $0x70] sm:$0xff]  }
 0x2f6   :  { %3352 = vmatprep.subr.bf16.mxu0 %v3886_v56 }
 0x2f8   :  { %2584 = vmatpush1.bf16.msra.mxu1 %v3847_v58  ;;  %v3887_v58 = vld [vmem:[#allocation11 + $0x30] sm:$0xff]  }
 0x2f9   :  { %2594 = vmatprep.subr.bf16.mxu1 %v3852_v59  ;;  %3353 = vmatpush3.bf16.msra.mxu0 %v3887_v58  ;;  %v3888_v59 = vld [vmem:[#allocation11 + $0x78] sm:$0xff]  }
 0x2fa   :  { %3354 = vmatprep.subr.bf16.mxu0 %v3888_v59 }
 0x2fd   :  { %3355 = vmatpush3.bf16.msra.mxu0 %v3889_v60 }
 0x2fe   :  { %3371 = vmatprep.subr.bf16.mxu0 %v4104_v61 }
 0x36e   :  { %v3312_v10 = vpop.f32.mrb[8].mxu1 }
 0x36f   :  { %v3313_v40 = vpop.f32.mrb[9].mxu1 }
 0x370   :  { %v3314_v11 = vadd.f32 %v3313_v40, %v3312_v10  ;;  %v3315_v12 = vpop.f32.mrb[10].mxu1 }
 0x371   :  { %v3316_v13 = vpop.f32.mrb[11].mxu1 }
 0x372   :  { %v2196_v17 = vadd.f32 %v3314_v11, %v1563_v1  ;;  %v3890_v13 = vld [vmem:[#allocation13] sm:$0xff]   ;;  %v3893_v1 = vld [vmem:[#allocation13 + $0x18] sm:$0xff]  }
 0x38e   :  { %v3334_v15 = vpop.f32.mrb[12].mxu1 }
 0x38f   :  { %v3335_v16 = vpop.f32.mrb[13].mxu1 }
 0x390   :  { %v3336_v18 = vadd.f32 %v3335_v16, %v3334_v15  ;;  %v3337_v19 = vpop.f32.mrb[14].mxu1  ;;  %v3894_v15 = vld [vmem:[#allocation13 + $0x20] sm:$0xff]   ;;  %v3895_v16 = vld [vmem:[#allocation13 + $0x28] sm:$0xff]  }
 0x391   :  { %v3338_v20 = vpop.f32.mrb[15].mxu1 }
 0x392   :  { %v2236_v21 = vadd.f32 %v3336_v18, %v2196_v17  ;;  %v3896_v17 = vld [vmem:[#allocation13 + $0x30] sm:$0xff]   ;;  %v3897_v18 = vld [vmem:[#allocation13 + $0x38] sm:$0xff]  }
 0x393   :  { %v3270_v20 = vld [vmem:[%s4363_s10] ss:$0 sm:$0xff]  ;;  %s4106_s10 = smov [#allocation14]  }
 0x394   :  { %v2246_v51 = vmul.f32 0.01, %v2236_v21  ;;  %vm2243_vm10 = vcmp.gt.f32.partialorder %v2236_v21, 0.0  ;;  %s2954_s3 = sshll.u32 %s4106_s10, 4  ;;  %s2955_s3 = int_to_ptr.vmem [resolvable:$true] %s2954_s3 }
 0x395   :  { %p4061_p1 = scmp.lt.s32.totalorder %s2955_s3, %s2955_s3 }
 0x396   :  { %v2249_v54 = vsel %vm2243_vm10, %v2236_v21, %v2246_v51 }
 0x397   :  { %v2252_v55 = vpack.c.bf16 %v2249_v54, %v2249_v54 }
 0x3ae   :  { %v2154_v23 = vpop.f32.mrb[8].mxu0 }
 0x3af   :  { %v3395_v53 = vadd.f32 %v2154_v23, %v1555_v22  ;;  %v2156_v24 = vpop.f32.mrb[9].mxu0 }
 0x3b0   :  { %v3396_v25 = vadd.f32 %v2156_v24, %v1559_v38  ;;  %v2158_v26 = vpop.f32.mrb[10].mxu0 }
 0x3b1   :  { %vm2241_vm8 = vcmp.gt.f32.partialorder %v3395_v53, 0.0  ;;  %v2244_v27 = vmul.f32 0.01, %v3395_v53  ;;  %v2159_v28 = vpop.f32.mrb[11].mxu0 }
 0x3b2   :  { %vm2242_vm9 = vcmp.gt.f32.partialorder %v3396_v25, 0.0  ;;  %v2245_v57 = vmul.f32 0.01, %v3396_v25  ;;  %v3287_v28 = vld [vmem:[%s4365_s12] ss:$0 sm:$0xff]  ;;  %s4056_s12 = scalar_lea.vmem %s2955_s3, 128 }
 0x3b3   :  { %v2247_v29 = vsel %vm2241_vm8, %v3395_v53, %v2244_v27  ;;  %v2934_v27 = vand.u32 127, %v174_v37  ;;  %p4057_p0 = scmp.ne.s32.totalorder %s2955_s3, %s4056_s12  ;;  %p4062_p2 = scmp.lt.s32.totalorder %s4056_s12, %s4056_s12 }
 0x3b4   :  { %v2248_v30 = vsel %vm2242_vm9, %v3396_v25, %v2245_v57  ;;  %v2250_v33 = vpack.c.bf16 %v2247_v29, %v2247_v29 }
 0x3b5   :  { %v2251_v31 = vpack.c.bf16 %v2248_v30, %v2248_v30  ;;  %vm2935_vm15 = vcmp.lt.s32.totalorder %v2934_v27, 10  ;;  %p4063_p3 = por %p4062_p2, %p4061_p1 }
 0x3b7   :  { %2585 = vmatprep.mubr.bf16.mxu1 %v2251_v31  ;;  %p4064_p4 = pnand %p4063_p3, %p4057_p0 }
 0x3b8   :  { %2586 = vmatmul.mubr.bf16.vlgmr.msra.gmra.mrb[16].mxu1 %v2250_v33 }
 0x3b9   :  { %2595 = vmatpush1.bf16.msra.mxu1 %v3850_v32  ;;  %2626 = vmatprep.mubr.bf16.mxu1 %v4103_v0  ;;  %v3868_v0 = vld [vmem:[#allocation10 + $0x160] ss:$8 sps:$4 sm:$0xff]  }
 0x3ba   :  { %2596 = vmatprep.subr.bf16.mxu1 %v3855_v34 }
 0x3bd   :  { %2597 = vmatpush1.bf16.msra.mxu1 %v3853_v35 }
 0x3be   :  { %2598 = vmatprep.subr.bf16.mxu1 %v3858_v36 }
 0x3c1   :  { %2599 = vmatpush1.bf16.msra.mxu1 %v3856_v42 }
 0x3c2   :  { %2600 = vmatprep.subr.bf16.mxu1 %v3861_v43 }
 0x3c5   :  { %2601 = vmatpush1.bf16.msra.mxu1 %v3859_v44 }
 0x3c6   :  { %2602 = vmatprep.subr.bf16.mxu1 %v3864_v45 }
 0x3c9   :  { %2603 = vmatpush1.bf16.msra.mxu1 %v3862_v46 }
 0x3ca   :  { %2604 = vmatprep.subr.bf16.mxu1 %v3867_v47 }
 0x3cd   :  { %2605 = vmatpush1.bf16.msra.mxu1 %v3865_v48 }
 0x3ce   :  { %2606 = vmatprep.subr.bf16.mxu1 %v3870_v49 }
 0x3d1   :  { %2607 = vmatpush1.bf16.msra.mxu1 %v3868_v0 }
 0x3d2   :  { %2608 = vmatprep.subr.bf16.mxu1 %v3873_v50 }
 0x3d5   :  { %2609 = vmatpush1.bf16.msra.mxu1 %v3871_v52 }
 0x3d8   :  { %2627 = vmatmul.mubr.bf16.vlgmr.msra.gmra.mrb[16].mxu1 %v2252_v55 }
 0x4ab   :  { %v2628_v3 = vpop.f32.mrb[16].mxu1 }
 0x4ac   :  { %v3397_v4 = vadd.f32 %v2628_v3, %v2306_v63  ;;  %v2630_v5 = vpop.f32.mrb[17].mxu1 }
 0x4ad   :  { %v3398_v6 = vadd.f32 %v2630_v5, %v2310_v2  ;;  %v2632_v7 = vpop.f32.mrb[18].mxu1 }
 0x4ae   :  { %vm2635_vm11 = vcmp.gt.f32.partialorder %v3397_v4, 0.0  ;;  %v2637_v8 = vmul.f32 0.01, %v3397_v4  ;;  %v2633_v9 = vpop.f32.mrb[19].mxu1 }
 0x4af   :  { %vm2636_vm12 = vcmp.gt.f32.partialorder %v3398_v6, 0.0  ;;  %v2638_v10 = vmul.f32 0.01, %v3398_v6 }
 0x4b0   :  { %v2639_v40 = vsel %vm2635_vm11, %v3397_v4, %v2637_v8 }
 0x4b1   :  { %v2640_v11 = vsel %vm2636_vm12, %v3398_v6, %v2638_v10  ;;  %v2641_v14 = vpack.c.bf16 %v2639_v40, %v2639_v40 }
 0x4b2   :  { %v2642_v12 = vpack.c.bf16 %v2640_v11, %v2640_v11 }
 0x4b4   :  { %2810 = vmatprep.mubr.bf16.mxu0 %v2642_v12 }
 0x4b5   :  { %2811 = vmatmul.mubr.bf16.vlgmr.msra.gmra.mrb[12].mxu0 %v2641_v14 }
 0x4b6   :  { %3372 = vmatpush3.bf16.msra.mxu0 %v3890_v13  ;;  %3387 = vmatprep.mubr.msk.bf16.mxu0 %vm4105_vm13, %v4104_v61 }
 0x4b7   :  { %3373 = vmatprep.subr.bf16.mxu0 %v4104_v61 }
 0x4ba   :  { %3374 = vmatpush3.bf16.msra.mxu0 %v3891_v39 }
 0x4bb   :  { %3375 = vmatprep.subr.bf16.mxu0 %v4104_v61 }
 0x4be   :  { %3376 = vmatpush3.bf16.msra.mxu0 %v3892_v41 }
 0x4bf   :  { %3377 = vmatprep.subr.bf16.mxu0 %v4104_v61 }
 0x4c2   :  { %3378 = vmatpush3.bf16.msra.mxu0 %v3893_v1 }
 0x4c3   :  { %3379 = vmatprep.subr.bf16.mxu0 %v4104_v61 }
 0x4c6   :  { %3380 = vmatpush3.bf16.msra.mxu0 %v3894_v15 }
 0x4c7   :  { %3381 = vmatprep.subr.bf16.mxu0 %v4104_v61 }
 0x4ca   :  { %3382 = vmatpush3.bf16.msra.mxu0 %v3895_v16 }
 0x4cb   :  { %3383 = vmatprep.subr.bf16.mxu0 %v4104_v61 }
 0x4ce   :  { %3384 = vmatpush3.bf16.msra.mxu0 %v3896_v17 }
 0x4cf   :  { %3385 = vmatprep.subr.bf16.mxu0 %v4104_v61 }
 0x4d2   :  { %3386 = vmatpush3.bf16.msra.mxu0 %v3897_v18 }
 0x588   :  { %v3356_v19 = vpop.f32.mrb[12].mxu0 }
 0x589   :  { %v3357_v21 = vpop.f32.mrb[13].mxu0 }
 0x58a   :  { %v3358_v22 = vadd.f32 %v3357_v21, %v3356_v19  ;;  %v3359_v38 = vpop.f32.mrb[14].mxu0 }
 0x58b   :  { %v3360_v23 = vpop.f32.mrb[15].mxu0 }
 0x58c   :  { %v2813_v53 = vadd.f32 %v3358_v22, %v3270_v20 }
 0x58e   :  { %vm2818_vm14 = vcmp.gt.f32.partialorder %v2813_v53, 0.0  ;;  %v2819_v24 = vmul.f32 0.01, %v2813_v53 }
 0x590   :  { %v2820_v25 = vsel %vm2818_vm14, %v2813_v53, %v2819_v24 }
 0x591   :  { %v2821_v26 = vpack.c.bf16 %v2820_v25, %v2820_v25 }
 0x593   :  { %3388 = vmatmul.mubr.bf16.vlgmr.msra.gmra.mrb[16].mxu0 %v2821_v26 }
 0x666   :  { %v2927_v57 = vpop.f32.mrb[16].mxu0 }
 0x667   :  { %v2928_v29 = vadd.f32 %v3287_v28, %v2927_v57  ;;  %v3389_v30 = vpop.f32.mrb[17].mxu0 }
 0x668   :  { %v2930_v31 = vpop.f32.mrb[18].mxu0 }
 0x669   :  { %v3390_v32 = vpop.f32.mrb[19].mxu0  ;;  %v2936_v33 = vsel %vm2935_vm15, %v2928_v29, -1e+30 }
 0x66a   :  { %2937 = vmax.xlane.f32.xlu0 %v2936_v33 }
 0x6f7   :  { %v2938_v34 = vpop.xlane.xlu0 %2937 }
 0x6f8   :  { %v2939_v35 = vsub.f32 %v2936_v33, %v2938_v34 }
 0x6fa   :  { %v2940_v36 = vmul.f32 1.442695, %v2939_v35 }
 0x6fc   :  { %3898 = vpow2.f32 %v2940_v36 }
 0x706   :  { %v3899_v42 = vpop.eup %3898 }
 0x707   :  { %2942 = vadd.xlane.f32.xlu0 %v3899_v42 }
 0x794   :  { %v2943_v43 = vpop.xlane.xlu0 %2942 }
 0x795   :  { %3900 = vlog2.f32 %v2943_v43 }
 0x79f   :  { %v3901_v37 = vpop.eup %3900 }
 0x7a0   :  { %v2945_v44 = vmul.f32 0.6931472, %v3901_v37 }
 0x7a2   :  { %v2946_v45 = vsub.f32 %v2939_v35, %v2945_v44 }
 0x7a4   :  { %2947 = vst [vmem:[#allocation14] sm:$0xff] %v2946_v45 }
 0x7a5   :  { %4067 = shalt.err (!%p4064_p4)
}
 0x7a6   :  { %s4068_s20 = scalar_lea.hbm %s4366_s13, 128 }
 0x7a7   :  { %p4069_p5 = scmp.ne.s32.totalorder %s4366_s13, %s4068_s20  ;;  %p4072_p6 = scmp.lt.u32.totalorder %s4068_s20, %s4366_s13 }
 0x7a9   :  { %p4074_p7 = pnand %p4072_p6, %p4069_p5 }
 0x7ab   :  { %4077 = shalt.err (!%p4074_p7)
}
 0x7ac   :  { %2957 = dma.vmem_to_hbm [thread:$0]  %s2955_s3, 128, %s4366_s13, [#allocation4]  }
 0x7ad   :  { %4086 = dma.done.wait [#allocation4], 128  }
 0x7ae   :  { %4087 = vsyncadd [#allocation4], 4294967168 }
 0x7af   :  { %2961 = vsyncpa [#allocation3], 1 }
 0x7b0   :  { %2962 = vsyncpa [#allocation6], 1 }
 0x7b1   :  { %2963 = vsyncpa [#allocation9], 1 }
 0x7b2   :  { %2964 = vsyncpa [#allocation12], 1 }
 0x7b3   :  { %2965 = vsyncpa [#allocation4], 1 }

</bundles_post_ra>
